<compile_context>
chip_gen: v6e
topology: v6e:2x2x1
jax: 0.10.0
libtpu: 0.0.40
codegen_flags: <defaults>
</compile_context>

<pallas_src>
import functools

import jax
import jax.numpy as jnp
from jax import lax
from jax.experimental import pallas as pl
from jax.experimental.pallas import tpu as pltpu


_VMEM_LIMIT = 32 * 1024 * 1024


def _round_up(x, m):
    return (x + m - 1) // m * m


# ----------------------------------------------------------------------------
# Generic tiled matmul + bias kernel (used for the input projection and the FC).
# ----------------------------------------------------------------------------
def _matmul_bias_kernel(x_ref, w_ref, b_ref, o_ref):
    acc = jnp.dot(x_ref[...], w_ref[...], preferred_element_type=jnp.float32)
    o_ref[...] = (acc + b_ref[...]).astype(o_ref.dtype)


def _tiled_matmul_bias(x, w, b, out_dtype):
    """out = x @ w + b, grid-tiled over (M, N); K kept whole (small here)."""
    M, K = x.shape
    _, N = w.shape
    # M is always a multiple of 8, N a multiple of 128 (padded in the wrapper).
    # NOTE: 128-wide N tiles also match the v5e MXU (4x128^2) natively.
    tm = next(t for t in (512, 256, 128, 64, 32, 16, 8) if M % t == 0)
    tn = next(t for t in (512, 384, 256, 128) if N % t == 0)
    grid = (M // tm, N // tn)
    return pl.pallas_call(
        _matmul_bias_kernel,
        out_shape=jax.ShapeDtypeStruct((M, N), out_dtype),
        grid_spec=pltpu.PrefetchScalarGridSpec(
            num_scalar_prefetch=0,
            grid=grid,
            in_specs=[
                pl.BlockSpec((tm, K), lambda i, j: (i, 0)),
                pl.BlockSpec((K, tn), lambda i, j: (0, j)),
                pl.BlockSpec((1, tn), lambda i, j: (0, j)),
            ],
            out_specs=pl.BlockSpec((tm, tn), lambda i, j: (i, j)),
        ),
        compiler_params=pltpu.CompilerParams(
            dimension_semantics=("parallel", "parallel"),
            vmem_limit_bytes=_VMEM_LIMIT),
    )(x, w, b)


# ----------------------------------------------------------------------------
# GRU recurrence kernel: serial over time, pipelined over T-tiles.
#   gi_ref : (Tt*Bp, 3Hp) f32   precomputed x@Wih^T + (b_ih + b_hh[r,z,0])
#   whh_ref: (Hp, 3Hp)          recurrent weights (MXU dtype)
#   bhn_ref: (1, Hp)   f32      b_hn (added inside r * (...))
#   h_all  : (Tt*Bp, Hp)        per-step hidden states (output)
#   h_state: (Bp, Hp)  f32      persistent hidden state across T-tiles
# ----------------------------------------------------------------------------
def _gru_recurrence_kernel(gi_ref, whh_ref, bhn_ref, h_all_ref, h_state,
                           *, t_tile, b_pad, h_pad):
    @pl.when(pl.program_id(0) == 0)
    def _():
        h_state[...] = jnp.zeros_like(h_state)     # h_0 = 0 (PyTorch default)

    whh = whh_ref[...]
    # Hoisted bias broadcast (JAX does not CSE broadcast_in_dim inside the loop).
    bhn = jnp.broadcast_to(bhn_ref[...], (b_pad, h_pad)).astype(jnp.float32)

    def step(t, h):
        row = pl.multiple_of(t * b_pad, b_pad)
        gi = gi_ref[pl.ds(row, b_pad), :]                                  # (Bp, 3Hp)
        gh = jnp.dot(h.astype(whh.dtype), whh,
                     preferred_element_type=jnp.float32)                   # (Bp, 3Hp)
        r = jax.nn.sigmoid(gi[:, 0:h_pad] + gh[:, 0:h_pad])
        z = jax.nn.sigmoid(gi[:, h_pad:2 * h_pad] + gh[:, h_pad:2 * h_pad])
        n = jnp.tanh(gi[:, 2 * h_pad:3 * h_pad]
                     + r * (gh[:, 2 * h_pad:3 * h_pad] + bhn))
        h_new = (1.0 - z) * n + z * h
        # Write once per step (never re-read) so the FC can be batched later.
        h_all_ref[pl.ds(row, b_pad), :] = h_new.astype(h_all_ref.dtype)
        return h_new

    h_last = lax.fori_loop(0, t_tile, step, h_state[...], unroll=True)
    h_state[...] = h_last


def _pick_t_tile(T, b_pad, max_rows=512):
    best = 1
    for t in range(1, T + 1):
        if T % t == 0 and t * b_pad <= max_rows:
            best = t
    return best


# ----------------------------------------------------------------------------
# Forward wrapper (mirrors DecoderRNN.forward).
# ----------------------------------------------------------------------------
@functools.partial(jax.jit, static_argnames=("compute_dtype",))
def decoder_rnn_forward(features, captions, params, *, compute_dtype=jnp.float32):
    """features: (B, E) f32, captions: (B, Tc) int32 -> logits (B, Tc, V) f32."""
    emb = params["embed"]          # (V, E)
    wih_t = params["wih_t"]        # (E, 3H)  gate order [r, z, n]
    whh_t = params["whh_t"]        # (H, 3H)
    bih = params["bih"]            # (1, 3H)
    bhh = params["bhh"]            # (1, 3H)
    wfc_t = params["wfc_t"]        # (H, V)
    bfc = params["bfc"]            # (1, V)

    B, E = features.shape
    H = whh_t.shape[0]
    V = wfc_t.shape[1]

    # ---- Glue (XLA): embedding gather + concat with image features. ----
    cap_emb = jnp.take(emb, captions[:, :-1], axis=0)                   # (B, Tc-1, E)
    inputs = jnp.concatenate([features[:, None, :], cap_emb], axis=1)   # (B, T, E)
    T = inputs.shape[1]

    # ---- Padded, lane-aligned shapes. ----
    Bp = _round_up(B, 8)
    Ep = _round_up(E, 128)
    Hp = _round_up(H, 128)
    Vp = _round_up(V, 128)

    # Gate-blocked weight padding: each gate block starts at a lane boundary.
    def pad_gates_2d(w, rows, rows_p):                    # (rows, 3H) -> (rows_p, 3Hp)
        w3 = w.reshape(rows, 3, H)
        w3 = jnp.pad(w3, ((0, rows_p - rows), (0, 0), (0, Hp - H)))
        return w3.reshape(rows_p, 3 * Hp)

    bih3 = jnp.pad(bih.reshape(1, 3, H), ((0, 0), (0, 0), (0, Hp - H)))
    bhh3 = jnp.pad(bhh.reshape(1, 3, H), ((0, 0), (0, 0), (0, Hp - H)))
    # Fuse b_hh for the r/z gates into the input-projection bias; keep b_hn apart
    # (it must sit inside r * (W_hn h + b_hn)).
    gate_mask = jnp.array([1.0, 1.0, 0.0], jnp.float32)[None, :, None]
    proj_bias = (bih3 + bhh3 * gate_mask).reshape(1, 3 * Hp).astype(jnp.float32)
    bhn_pad = bhh3[:, 2, :].astype(jnp.float32)                         # (1, Hp)

    wih_p = pad_gates_2d(wih_t, E, Ep).astype(compute_dtype)            # (Ep, 3Hp)
    whh_p = pad_gates_2d(whh_t, H, Hp).astype(compute_dtype)            # (Hp, 3Hp)
    wfc_p = jnp.pad(wfc_t, ((0, Hp - H), (0, Vp - V))).astype(compute_dtype)
    bfc_p = jnp.pad(bfc, ((0, 0), (0, Vp - V))).astype(jnp.float32)     # (1, Vp)

    # Time-major, padded, flattened input: (T*Bp, Ep).
    # TODO(synk): the (B,T,E)->(T,B,E) transpose (and the inverse on the output)
    # is an extra HBM round trip; it could be folded into the kernels' BlockSpecs.
    x_tm = jnp.transpose(inputs, (1, 0, 2)).astype(jnp.float32)
    x_tm = jnp.pad(x_tm, ((0, 0), (0, Bp - B), (0, Ep - E)))
    x_flat = x_tm.reshape(T * Bp, Ep).astype(compute_dtype)

    # ---- 1) Hoisted input projection: one big pipelined MXU matmul. ----
    gi_all = _tiled_matmul_bias(x_flat, wih_p, proj_bias, jnp.float32)  # (T*Bp, 3Hp)

    # ---- 2) Serial GRU recurrence, pipelined over T-tiles. ----
    t_tile = _pick_t_tile(T, Bp)
    num_t_tiles = T // t_tile
    h_all = pl.pallas_call(
        functools.partial(_gru_recurrence_kernel,
                          t_tile=t_tile, b_pad=Bp, h_pad=Hp),
        out_shape=jax.ShapeDtypeStruct((T * Bp, Hp), compute_dtype),
        grid_spec=pltpu.PrefetchScalarGridSpec(
            num_scalar_prefetch=0,
            grid=(num_t_tiles,),
            in_specs=[
                pl.BlockSpec((t_tile * Bp, 3 * Hp), lambda i: (i, 0)),
                pl.BlockSpec((Hp, 3 * Hp), lambda i: (0, 0)),
                pl.BlockSpec((1, Hp), lambda i: (0, 0)),
            ],
            out_specs=pl.BlockSpec((t_tile * Bp, Hp), lambda i: (i, 0)),
            scratch_shapes=[pltpu.VMEM((Bp, Hp), jnp.float32)],
        ),
        compiler_params=pltpu.CompilerParams(
            dimension_semantics=("arbitrary",),
            vmem_limit_bytes=_VMEM_LIMIT),
    )(gi_all, whh_p, bhn_pad)

    # ---- 3) Batched FC over all timesteps: (T*Bp, Hp) @ (Hp, Vp). ----
    logits_flat = _tiled_matmul_bias(h_all, wfc_p, bfc_p, jnp.float32)  # (T*Bp, Vp)

    logits = logits_flat.reshape(T, Bp, Vp)[:, :B, :V]
    return jnp.transpose(logits, (1, 0, 2))                            # (B, T, V)


# ----------------------------------------------------------------------------
# Pure-JAX reference (ground truth for the kernel).
# ----------------------------------------------------------------------------
def decoder_rnn_reference(features, captions, params):
    emb = params["embed"]
    wih_t, whh_t = params["wih_t"], params["whh_t"]
    bih, bhh = params["bih"], params["bhh"]
    wfc_t, bfc = params["wfc_t"], params["bfc"]
    H = whh_t.shape[0]

    cap_emb = jnp.take(emb, captions[:, :-1], axis=0)
    inputs = jnp.concatenate([features[:, None, :], cap_emb], axis=1)
    B, T, _ = inputs.shape

    def step(h, x_t):
        gi = x_t @ wih_t + bih
        gh = h @ whh_t + bhh
        r = jax.nn.sigmoid(gi[:, :H] + gh[:, :H])
        z = jax.nn.sigmoid(gi[:, H:2 * H] + gh[:, H:2 * H])
        n = jnp.tanh(gi[:, 2 * H:] + r * gh[:, 2 * H:])
        h_new = (1.0 - z) * n + z * h
        return h_new, h_new @ wfc_t + bfc

    h0 = jnp.zeros((B, H), jnp.float32)
    _, outs = lax.scan(step, h0, jnp.transpose(inputs, (1, 0, 2)))
    return jnp.transpose(outs, (1, 0, 2))


# ----------------------------------------------------------------------------
# Deterministic parameter init (shapes from DecoderRNN.__init__).
# ----------------------------------------------------------------------------
def init_params(key, embed_size, hidden_size, vocab_size):
    k = jax.random.split(key, 7)
    E, H, V = embed_size, hidden_size, vocab_size

    emb = jax.random.uniform(k[0], (V, E), jnp.float32,
                             -jnp.sqrt(6.0 / E), jnp.sqrt(6.0 / E))
    s = 1.0 / jnp.sqrt(H)
    wih = jax.random.uniform(k[1], (3 * H, E), jnp.float32, -s, s)
    whh = jax.random.uniform(k[2], (3 * H, H), jnp.float32, -s, s)
    bih = jax.random.uniform(k[3], (3 * H,), jnp.float32, -s, s)
    bhh = jax.random.uniform(k[4], (3 * H,), jnp.float32, -s, s)
    xb = jnp.sqrt(6.0 / (H + V))
    wfc = jax.random.uniform(k[5], (V, H), jnp.float32, -xb, xb)
    bfc = jax.random.uniform(k[6], (V,), jnp.float32, -s, s)

    return {
        "embed": emb,
        "wih_t": wih.T,                 # (E, 3H)
        "whh_t": whh.T,                 # (H, 3H)
        "bih": bih[None, :],            # (1, 3H)
        "bhh": bhh[None, :],            # (1, 3H)
        "wfc_t": wfc.T,                 # (H, V)
        "bfc": bfc[None, :],            # (1, V)
    }


if __name__ == "__main__":
    embed_size, hidden_size, vocab_size = 32, 32, 64
    batch, cap_len = 2, 8

    key = jax.random.PRNGKey(0)
    kp, kf, kc = jax.random.split(key, 3)

    params = init_params(kp, embed_size, hidden_size, vocab_size)
    features = jax.random.normal(kf, (batch, embed_size), jnp.float32)
    captions = jax.random.randint(kc, (batch, cap_len), 0, vocab_size, jnp.int32)

    ref = decoder_rnn_reference(features, captions, params)

    # f32 MXU path: tight correctness check against the pure-JAX reference.
    out = decoder_rnn_forward(features, captions, params, compute_dtype=jnp.float32)
    out = jax.block_until_ready(out)
    assert out.shape == (batch, cap_len, vocab_size), out.shape
    assert jnp.allclose(out, ref, atol=1e-4, rtol=1e-4), \
        float(jnp.max(jnp.abs(out - ref)))

    # bf16 MXU operands (recommended on v6e/v7x), f32 accumulation & gate math.
    out_bf16 = decoder_rnn_forward(features, captions, params,
                                   compute_dtype=jnp.bfloat16)
    out_bf16 = jax.block_until_ready(out_bf16)
    assert out_bf16.shape == (batch, cap_len, vocab_size)
    assert float(jnp.max(jnp.abs(out_bf16 - ref))) < 0.25

    print("KERNEL_OK")
</pallas_src>

<mosaic_0001>
module attributes {stable_mosaic.version = 11 : i64} {
  func.func @_matmul_bias_kernel(%arg0: i32, %arg1: i32, %arg2: memref<64x128xf32, #tpu.memory_space<vmem>>, %arg3: memref<128x384xf32, #tpu.memory_space<vmem>>, %arg4: memref<1x384xf32, #tpu.memory_space<vmem>>, %arg5: memref<64x384xf32, #tpu.memory_space<vmem>>) attributes {dimension_semantics = [#tpu.dimension_semantics<parallel>, #tpu.dimension_semantics<parallel>], iteration_bounds = array<i64: 1, 1>, scalar_prefetch = 0 : i64, scratch_operands = 0 : i64, tpu.core_type = #tpu.core_type<tc>, window_params = [{transform_indices = @transform_0, window_bounds = array<i64: 64, 128>}, {transform_indices = @transform_1, window_bounds = array<i64: 128, 384>}, {transform_indices = @transform_2, window_bounds = array<i64: 1, 384>}, {transform_indices = @transform_3, window_bounds = array<i64: 64, 384>}]} {
    %c0 = arith.constant 0 : index
    %c0_0 = arith.constant 0 : index
    %0 = vector.load %arg2[%c0, %c0_0] : memref<64x128xf32, #tpu.memory_space<vmem>>, vector<64x128xf32>
    %c0_1 = arith.constant 0 : index
    %c0_2 = arith.constant 0 : index
    %1 = vector.load %arg3[%c0_1, %c0_2] : memref<128x384xf32, #tpu.memory_space<vmem>>, vector<128x384xf32>
    %cst = arith.constant dense<0.000000e+00> : vector<64x384xf32>
    %2 = tpu.matmul %0, %1, %cst {dimension_numbers = #tpu.dot_dimension_numbers<[1], [0], [0], [1], [0, 0, 1, 1], [], []>} : vector<64x128xf32>, vector<128x384xf32>, vector<64x384xf32> -> vector<64x384xf32>
    %c0_3 = arith.constant 0 : index
    %c0_4 = arith.constant 0 : index
    %3 = vector.load %arg4[%c0_3, %c0_4] : memref<1x384xf32, #tpu.memory_space<vmem>>, vector<1x384xf32>
    %4 = vector.broadcast %3 : vector<1x384xf32> to vector<64x384xf32>
    %5 = arith.addf %2, %4 : vector<64x384xf32>
    %c0_5 = arith.constant 0 : index
    %c0_6 = arith.constant 0 : index
    %6 = vector.load %arg5[%c0_5, %c0_6] : memref<64x384xf32, #tpu.memory_space<vmem>>, vector<64x384xf32>
    tpu.vector_store %arg5[%c0_5, %c0_6], %5 {strides = array<i32>} : memref<64x384xf32, #tpu.memory_space<vmem>>, vector<64x384xf32>,
    return
  }
  func.func @transform_0(%arg0: i32, %arg1: i32) -> (i32, i32) {
    %c0_i32 = arith.constant 0 : i32
    %c0_i32_0 = arith.constant 0 : i32
    return %arg0, %c0_i32 : i32, i32
  }
  func.func @transform_1(%arg0: i32, %arg1: i32) -> (i32, i32) {
    %c0_i32 = arith.constant 0 : i32
    %c0_i32_0 = arith.constant 0 : i32
    return %c0_i32, %arg1 : i32, i32
  }
  func.func @transform_2(%arg0: i32, %arg1: i32) -> (i32, i32) {
    %c0_i32 = arith.constant 0 : i32
    %c0_i32_0 = arith.constant 0 : i32
    return %c0_i32, %arg1 : i32, i32
  }
  func.func @transform_3(%arg0: i32, %arg1: i32) -> (i32, i32) {
    %c0_i32 = arith.constant 0 : i32
    return %arg0, %arg1 : i32, i32
  }
}

module attributes {stable_mosaic.version = 11 : i64} {
  func.func @_matmul_bias_kernel(%arg0: i32, %arg1: i32, %arg2: memref<64x128xf32, #tpu.memory_space<vmem>>, %arg3: memref<128x128xf32, #tpu.memory_space<vmem>>, %arg4: memref<1x128xf32, #tpu.memory_space<vmem>>, %arg5: memref<64x128xf32, #tpu.memory_space<vmem>>) attributes {dimension_semantics = [#tpu.dimension_semantics<parallel>, #tpu.dimension_semantics<parallel>], iteration_bounds = array<i64: 1, 1>, scalar_prefetch = 0 : i64, scratch_operands = 0 : i64, tpu.core_type = #tpu.core_type<tc>, window_params = [{transform_indices = @transform_0, window_bounds = array<i64: 64, 128>}, {transform_indices = @transform_1, window_bounds = array<i64: 128, 128>}, {transform_indices = @transform_2, window_bounds = array<i64: 1, 128>}, {transform_indices = @transform_3, window_bounds = array<i64: 64, 128>}]} {
    %c0 = arith.constant 0 : index
    %c0_0 = arith.constant 0 : index
    %0 = vector.load %arg2[%c0, %c0_0] : memref<64x128xf32, #tpu.memory_space<vmem>>, vector<64x128xf32>
    %c0_1 = arith.constant 0 : index
    %c0_2 = arith.constant 0 : index
    %1 = vector.load %arg3[%c0_1, %c0_2] : memref<128x128xf32, #tpu.memory_space<vmem>>, vector<128x128xf32>
    %cst = arith.constant dense<0.000000e+00> : vector<64x128xf32>
    %2 = tpu.matmul %0, %1, %cst {dimension_numbers = #tpu.dot_dimension_numbers<[1], [0], [0], [1], [0, 0, 1, 1], [], []>} : vector<64x128xf32>, vector<128x128xf32>, vector<64x128xf32> -> vector<64x128xf32>
    %c0_3 = arith.constant 0 : index
    %c0_4 = arith.constant 0 : index
    %3 = vector.load %arg4[%c0_3, %c0_4] : memref<1x128xf32, #tpu.memory_space<vmem>>, vector<1x128xf32>
    %4 = vector.broadcast %3 : vector<1x128xf32> to vector<64x128xf32>
    %5 = arith.addf %2, %4 : vector<64x128xf32>
    %c0_5 = arith.constant 0 : index
    %c0_6 = arith.constant 0 : index
    %6 = vector.load %arg5[%c0_5, %c0_6] : memref<64x128xf32, #tpu.memory_space<vmem>>, vector<64x128xf32>
    tpu.vector_store %arg5[%c0_5, %c0_6], %5 {strides = array<i32>} : memref<64x128xf32, #tpu.memory_space<vmem>>, vector<64x128xf32>,
    return
  }
  func.func @transform_0(%arg0: i32, %arg1: i32) -> (i32, i32) {
    %c0_i32 = arith.constant 0 : i32
    %c0_i32_0 = arith.constant 0 : i32
    return %arg0, %c0_i32 : i32, i32
  }
  func.func @transform_1(%arg0: i32, %arg1: i32) -> (i32, i32) {
    %c0_i32 = arith.constant 0 : i32
    %c0_i32_0 = arith.constant 0 : i32
    return %c0_i32, %arg1 : i32, i32
  }
  func.func @transform_2(%arg0: i32, %arg1: i32) -> (i32, i32) {
    %c0_i32 = arith.constant 0 : i32
    %c0_i32_0 = arith.constant 0 : i32
    return %c0_i32, %arg1 : i32, i32
  }
  func.func @transform_3(%arg0: i32, %arg1: i32) -> (i32, i32) {
    %c0_i32 = arith.constant 0 : i32
    return %arg0, %arg1 : i32, i32
  }
}

module attributes {stable_mosaic.version = 11 : i64} {
  func.func @_gru_recurrence_kernel(%arg0: i32, %arg1: memref<64x384xf32, #tpu.memory_space<vmem>>, %arg2: memref<128x384xf32, #tpu.memory_space<vmem>>, %arg3: memref<1x128xf32, #tpu.memory_space<vmem>>, %arg4: memref<64x128xf32, #tpu.memory_space<vmem>>, %arg5: memref<8x128xf32, #tpu.memory_space<vmem>>) attributes {dimension_semantics = [#tpu.dimension_semantics<arbitrary>], iteration_bounds = array<i64: 1>, scalar_prefetch = 0 : i64, scratch_operands = 1 : i64, tpu.core_type = #tpu.core_type<tc>, window_params = [{transform_indices = @transform_0, window_bounds = array<i64: 64, 384>}, {pipeline_mode = #tpu.pipeline_mode<synchronous>, transform_indices = @transform_1, window_bounds = array<i64: 128, 384>}, {pipeline_mode = #tpu.pipeline_mode<synchronous>, transform_indices = @transform_2, window_bounds = array<i64: 1, 128>}, {transform_indices = @transform_3, window_bounds = array<i64: 64, 128>}]} {
    %c0_i32 = arith.constant 0 : i32
    %0 = arith.cmpi eq, %arg0, %c0_i32 : i32
    %1 = arith.extui %0 : i1 to i32
    %c0_i32_0 = arith.constant 0 : i32
    %2 = arith.cmpi ne, %1, %c0_i32_0 : i32
    scf.if %2 {
      %cst_64 = arith.constant 0.000000e+00 : f32
      %281 = vector.broadcast %cst_64 : f32 to vector<8x128xf32>
      %c0_65 = arith.constant 0 : index
      %c0_66 = arith.constant 0 : index
      %282 = vector.load %arg5[%c0_65, %c0_66] : memref<8x128xf32, #tpu.memory_space<vmem>>, vector<8x128xf32>
      tpu.vector_store %arg5[%c0_65, %c0_66], %281 {strides = array<i32>} : memref<8x128xf32, #tpu.memory_space<vmem>>, vector<8x128xf32>,
    } else {
    }
    %c0 = arith.constant 0 : index
    %c0_1 = arith.constant 0 : index
    %3 = vector.load %arg2[%c0, %c0_1] : memref<128x384xf32, #tpu.memory_space<vmem>>, vector<128x384xf32>
    %c0_2 = arith.constant 0 : index
    %c0_3 = arith.constant 0 : index
    %4 = vector.load %arg3[%c0_2, %c0_3] : memref<1x128xf32, #tpu.memory_space<vmem>>, vector<1x128xf32>
    %5 = vector.shape_cast %4 : vector<1x128xf32> to vector<1x128xf32>
    %6 = vector.broadcast %5 : vector<1x128xf32> to vector<8x128xf32>
    %c0_4 = arith.constant 0 : index
    %c0_5 = arith.constant 0 : index
    %7 = vector.load %arg5[%c0_4, %c0_5] : memref<8x128xf32, #tpu.memory_space<vmem>>, vector<8x128xf32>
    %c0_i32_6 = arith.constant 0 : i32
    %c8_i32 = arith.constant 8 : i32
    %8 = arith.muli %c0_i32_6, %c8_i32 : i32
    %9 = tpu.assume_multiple %8, 8 : i32
    %10 = arith.index_cast %9 : i32 to index
    %c0_7 = arith.constant 0 : index
    %11 = vector.load %arg1[%10, %c0_7] : memref<64x384xf32, #tpu.memory_space<vmem>>, vector<8x384xf32>
    %cst = arith.constant dense<0.000000e+00> : vector<8x384xf32>
    %12 = tpu.matmul %7, %3, %cst {dimension_numbers = #tpu.dot_dimension_numbers<[1], [0], [0], [1], [0, 0, 1, 1], [], []>} : vector<8x128xf32>, vector<128x384xf32>, vector<8x384xf32> -> vector<8x384xf32>
    %13 = vector.extract_strided_slice %11 {offsets = [0, 0], sizes = [8, 128], strides = [1, 1]} : vector<8x384xf32> to vector<8x128xf32>
    %14 = vector.extract_strided_slice %12 {offsets = [0, 0], sizes = [8, 128], strides = [1, 1]} : vector<8x384xf32> to vector<8x128xf32>
    %15 = arith.addf %13, %14 : vector<8x128xf32>
    %16 = arith.negf %15 : vector<8x128xf32>
    %17 = math.exp %16 : vector<8x128xf32>
    %cst_8 = arith.constant 1.000000e+00 : f32
    %18 = vector.broadcast %cst_8 : f32 to vector<8x128xf32>
    %19 = arith.addf %18, %17 : vector<8x128xf32>
    %20 = arith.divf %18, %19 : vector<8x128xf32>
    %21 = vector.extract_strided_slice %11 {offsets = [0, 128], sizes = [8, 128], strides = [1, 1]} : vector<8x384xf32> to vector<8x128xf32>
    %22 = vector.extract_strided_slice %12 {offsets = [0, 128], sizes = [8, 128], strides = [1, 1]} : vector<8x384xf32> to vector<8x128xf32>
    %23 = arith.addf %21, %22 : vector<8x128xf32>
    %24 = arith.negf %23 : vector<8x128xf32>
    %25 = math.exp %24 : vector<8x128xf32>
    %cst_9 = arith.constant 1.000000e+00 : f32
    %26 = vector.broadcast %cst_9 : f32 to vector<8x128xf32>
    %27 = arith.addf %26, %25 : vector<8x128xf32>
    %28 = arith.divf %26, %27 : vector<8x128xf32>
    %29 = vector.extract_strided_slice %11 {offsets = [0, 256], sizes = [8, 128], strides = [1, 1]} : vector<8x384xf32> to vector<8x128xf32>
    %30 = vector.extract_strided_slice %12 {offsets = [0, 256], sizes = [8, 128], strides = [1, 1]} : vector<8x384xf32> to vector<8x128xf32>
    %31 = arith.addf %30, %6 : vector<8x128xf32>
    %32 = arith.mulf %20, %31 : vector<8x128xf32>
    %33 = arith.addf %29, %32 : vector<8x128xf32>
    %34 = math.tanh %33 : vector<8x128xf32>
    %cst_10 = arith.constant 1.000000e+00 : f32
    %35 = vector.broadcast %cst_10 : f32 to vector<8x128xf32>
    %36 = arith.subf %35, %28 : vector<8x128xf32>
    %37 = arith.mulf %36, %34 : vector<8x128xf32>
    %38 = arith.mulf %28, %7 : vector<8x128xf32>
    %39 = arith.addf %37, %38 : vector<8x128xf32>
    %40 = arith.index_cast %9 : i32 to index
    %c0_11 = arith.constant 0 : index
    %41 = vector.load %arg4[%40, %c0_11] : memref<64x128xf32, #tpu.memory_space<vmem>>, vector<8x128xf32>
    tpu.vector_store %arg4[%40, %c0_11], %39 {strides = array<i32>} : memref<64x128xf32, #tpu.memory_space<vmem>>, vector<8x128xf32>,
    %c1_i32 = arith.constant 1 : i32
    %c8_i32_12 = arith.constant 8 : i32
    %42 = arith.muli %c1_i32, %c8_i32_12 : i32
    %43 = tpu.assume_multiple %42, 8 : i32
    %44 = arith.index_cast %43 : i32 to index
    %c0_13 = arith.constant 0 : index
    %45 = vector.load %arg1[%44, %c0_13] : memref<64x384xf32, #tpu.memory_space<vmem>>, vector<8x384xf32>
    %cst_14 = arith.constant dense<0.000000e+00> : vector<8x384xf32>
    %46 = tpu.matmul %39, %3, %cst_14 {dimension_numbers = #tpu.dot_dimension_numbers<[1], [0], [0], [1], [0, 0, 1, 1], [], []>} : vector<8x128xf32>, vector<128x384xf32>, vector<8x384xf32> -> vector<8x384xf32>
    %47 = vector.extract_strided_slice %45 {offsets = [0, 0], sizes = [8, 128], strides = [1, 1]} : vector<8x384xf32> to vector<8x128xf32>
    %48 = vector.extract_strided_slice %46 {offsets = [0, 0], sizes = [8, 128], strides = [1, 1]} : vector<8x384xf32> to vector<8x128xf32>
    %49 = arith.addf %47, %48 : vector<8x128xf32>
    %50 = arith.negf %49 : vector<8x128xf32>
    %51 = math.exp %50 : vector<8x128xf32>
    %cst_15 = arith.constant 1.000000e+00 : f32
    %52 = vector.broadcast %cst_15 : f32 to vector<8x128xf32>
    %53 = arith.addf %52, %51 : vector<8x128xf32>
    %54 = arith.divf %52, %53 : vector<8x128xf32>
    %55 = vector.extract_strided_slice %45 {offsets = [0, 128], sizes = [8, 128], strides = [1, 1]} : vector<8x384xf32> to vector<8x128xf32>
    %56 = vector.extract_strided_slice %46 {offsets = [0, 128], sizes = [8, 128], strides = [1, 1]} : vector<8x384xf32> to vector<8x128xf32>
    %57 = arith.addf %55, %56 : vector<8x128xf32>
    %58 = arith.negf %57 : vector<8x128xf32>
    %59 = math.exp %58 : vector<8x128xf32>
    %cst_16 = arith.constant 1.000000e+00 : f32
    %60 = vector.broadcast %cst_16 : f32 to vector<8x128xf32>
    %61 = arith.addf %60, %59 : vector<8x128xf32>
    %62 = arith.divf %60, %61 : vector<8x128xf32>
    %63 = vector.extract_strided_slice %45 {offsets = [0, 256], sizes = [8, 128], strides = [1, 1]} : vector<8x384xf32> to vector<8x128xf32>
    %64 = vector.extract_strided_slice %46 {offsets = [0, 256], sizes = [8, 128], strides = [1, 1]} : vector<8x384xf32> to vector<8x128xf32>
    %65 = arith.addf %64, %6 : vector<8x128xf32>
    %66 = arith.mulf %54, %65 : vector<8x128xf32>
    %67 = arith.addf %63, %66 : vector<8x128xf32>
    %68 = math.tanh %67 : vector<8x128xf32>
    %cst_17 = arith.constant 1.000000e+00 : f32
    %69 = vector.broadcast %cst_17 : f32 to vector<8x128xf32>
    %70 = arith.subf %69, %62 : vector<8x128xf32>
    %71 = arith.mulf %70, %68 : vector<8x128xf32>
    %72 = arith.mulf %62, %39 : vector<8x128xf32>
    %73 = arith.addf %71, %72 : vector<8x128xf32>
    %74 = arith.index_cast %43 : i32 to index
    %c0_18 = arith.constant 0 : index
    %75 = vector.load %arg4[%74, %c0_18] : memref<64x128xf32, #tpu.memory_space<vmem>>, vector<8x128xf32>
    tpu.vector_store %arg4[%74, %c0_18], %73 {strides = array<i32>} : memref<64x128xf32, #tpu.memory_space<vmem>>, vector<8x128xf32>,
    %c2_i32 = arith.constant 2 : i32
    %c8_i32_19 = arith.constant 8 : i32
    %76 = arith.muli %c2_i32, %c8_i32_19 : i32
    %77 = tpu.assume_multiple %76, 8 : i32
    %78 = arith.index_cast %77 : i32 to index
    %c0_20 = arith.constant 0 : index
    %79 = vector.load %arg1[%78, %c0_20] : memref<64x384xf32, #tpu.memory_space<vmem>>, vector<8x384xf32>
    %cst_21 = arith.constant dense<0.000000e+00> : vector<8x384xf32>
    %80 = tpu.matmul %73, %3, %cst_21 {dimension_numbers = #tpu.dot_dimension_numbers<[1], [0], [0], [1], [0, 0, 1, 1], [], []>} : vector<8x128xf32>, vector<128x384xf32>, vector<8x384xf32> -> vector<8x384xf32>
    %81 = vector.extract_strided_slice %79 {offsets = [0, 0], sizes = [8, 128], strides = [1, 1]} : vector<8x384xf32> to vector<8x128xf32>
    %82 = vector.extract_strided_slice %80 {offsets = [0, 0], sizes = [8, 128], strides = [1, 1]} : vector<8x384xf32> to vector<8x128xf32>
    %83 = arith.addf %81, %82 : vector<8x128xf32>
    %84 = arith.negf %83 : vector<8x128xf32>
    %85 = math.exp %84 : vector<8x128xf32>
    %cst_22 = arith.constant 1.000000e+00 : f32
    %86 = vector.broadcast %cst_22 : f32 to vector<8x128xf32>
    %87 = arith.addf %86, %85 : vector<8x128xf32>
    %88 = arith.divf %86, %87 : vector<8x128xf32>
    %89 = vector.extract_strided_slice %79 {offsets = [0, 128], sizes = [8, 128], strides = [1, 1]} : vector<8x384xf32> to vector<8x128xf32>
    %90 = vector.extract_strided_slice %80 {offsets = [0, 128], sizes = [8, 128], strides = [1, 1]} : vector<8x384xf32> to vector<8x128xf32>
    %91 = arith.addf %89, %90 : vector<8x128xf32>
    %92 = arith.negf %91 : vector<8x128xf32>
    %93 = math.exp %92 : vector<8x128xf32>
    %cst_23 = arith.constant 1.000000e+00 : f32
    %94 = vector.broadcast %cst_23 : f32 to vector<8x128xf32>
    %95 = arith.addf %94, %93 : vector<8x128xf32>
    %96 = arith.divf %94, %95 : vector<8x128xf32>
    %97 = vector.extract_strided_slice %79 {offsets = [0, 256], sizes = [8, 128], strides = [1, 1]} : vector<8x384xf32> to vector<8x128xf32>
    %98 = vector.extract_strided_slice %80 {offsets = [0, 256], sizes = [8, 128], strides = [1, 1]} : vector<8x384xf32> to vector<8x128xf32>
    %99 = arith.addf %98, %6 : vector<8x128xf32>
    %100 = arith.mulf %88, %99 : vector<8x128xf32>
    %101 = arith.addf %97, %100 : vector<8x128xf32>
    %102 = math.tanh %101 : vector<8x128xf32>
    %cst_24 = arith.constant 1.000000e+00 : f32
    %103 = vector.broadcast %cst_24 : f32 to vector<8x128xf32>
    %104 = arith.subf %103, %96 : vector<8x128xf32>
    %105 = arith.mulf %104, %102 : vector<8x128xf32>
    %106 = arith.mulf %96, %73 : vector<8x128xf32>
    %107 = arith.addf %105, %106 : vector<8x128xf32>
    %108 = arith.index_cast %77 : i32 to index
    %c0_25 = arith.constant 0 : index
    %109 = vector.load %arg4[%108, %c0_25] : memref<64x128xf32, #tpu.memory_space<vmem>>, vector<8x128xf32>
    tpu.vector_store %arg4[%108, %c0_25], %107 {strides = array<i32>} : memref<64x128xf32, #tpu.memory_space<vmem>>, vector<8x128xf32>,
    %c3_i32 = arith.constant 3 : i32
    %c8_i32_26 = arith.constant 8 : i32
    %110 = arith.muli %c3_i32, %c8_i32_26 : i32
    %111 = tpu.assume_multiple %110, 8 : i32
    %112 = arith.index_cast %111 : i32 to index
    %c0_27 = arith.constant 0 : index
    %113 = vector.load %arg1[%112, %c0_27] : memref<64x384xf32, #tpu.memory_space<vmem>>, vector<8x384xf32>
    %cst_28 = arith.constant dense<0.000000e+00> : vector<8x384xf32>
    %114 = tpu.matmul %107, %3, %cst_28 {dimension_numbers = #tpu.dot_dimension_numbers<[1], [0], [0], [1], [0, 0, 1, 1], [], []>} : vector<8x128xf32>, vector<128x384xf32>, vector<8x384xf32> -> vector<8x384xf32>
    %115 = vector.extract_strided_slice %113 {offsets = [0, 0], sizes = [8, 128], strides = [1, 1]} : vector<8x384xf32> to vector<8x128xf32>
    %116 = vector.extract_strided_slice %114 {offsets = [0, 0], sizes = [8, 128], strides = [1, 1]} : vector<8x384xf32> to vector<8x128xf32>
    %117 = arith.addf %115, %116 : vector<8x128xf32>
    %118 = arith.negf %117 : vector<8x128xf32>
    %119 = math.exp %118 : vector<8x128xf32>
    %cst_29 = arith.constant 1.000000e+00 : f32
    %120 = vector.broadcast %cst_29 : f32 to vector<8x128xf32>
    %121 = arith.addf %120, %119 : vector<8x128xf32>
    %122 = arith.divf %120, %121 : vector<8x128xf32>
    %123 = vector.extract_strided_slice %113 {offsets = [0, 128], sizes = [8, 128], strides = [1, 1]} : vector<8x384xf32> to vector<8x128xf32>
    %124 = vector.extract_strided_slice %114 {offsets = [0, 128], sizes = [8, 128], strides = [1, 1]} : vector<8x384xf32> to vector<8x128xf32>
    %125 = arith.addf %123, %124 : vector<8x128xf32>
    %126 = arith.negf %125 : vector<8x128xf32>
    %127 = math.exp %126 : vector<8x128xf32>
    %cst_30 = arith.constant 1.000000e+00 : f32
    %128 = vector.broadcast %cst_30 : f32 to vector<8x128xf32>
    %129 = arith.addf %128, %127 : vector<8x128xf32>
    %130 = arith.divf %128, %129 : vector<8x128xf32>
    %131 = vector.extract_strided_slice %113 {offsets = [0, 256], sizes = [8, 128], strides = [1, 1]} : vector<8x384xf32> to vector<8x128xf32>
    %132 = vector.extract_strided_slice %114 {offsets = [0, 256], sizes = [8, 128], strides = [1, 1]} : vector<8x384xf32> to vector<8x128xf32>
    %133 = arith.addf %132, %6 : vector<8x128xf32>
    %134 = arith.mulf %122, %133 : vector<8x128xf32>
    %135 = arith.addf %131, %134 : vector<8x128xf32>
    %136 = math.tanh %135 : vector<8x128xf32>
    %cst_31 = arith.constant 1.000000e+00 : f32
    %137 = vector.broadcast %cst_31 : f32 to vector<8x128xf32>
    %138 = arith.subf %137, %130 : vector<8x128xf32>
    %139 = arith.mulf %138, %136 : vector<8x128xf32>
    %140 = arith.mulf %130, %107 : vector<8x128xf32>
    %141 = arith.addf %139, %140 : vector<8x128xf32>
    %142 = arith.index_cast %111 : i32 to index
    %c0_32 = arith.constant 0 : index
    %143 = vector.load %arg4[%142, %c0_32] : memref<64x128xf32, #tpu.memory_space<vmem>>, vector<8x128xf32>
    tpu.vector_store %arg4[%142, %c0_32], %141 {strides = array<i32>} : memref<64x128xf32, #tpu.memory_space<vmem>>, vector<8x128xf32>,
    %c4_i32 = arith.constant 4 : i32
    %c8_i32_33 = arith.constant 8 : i32
    %144 = arith.muli %c4_i32, %c8_i32_33 : i32
    %145 = tpu.assume_multiple %144, 8 : i32
    %146 = arith.index_cast %145 : i32 to index
    %c0_34 = arith.constant 0 : index
    %147 = vector.load %arg1[%146, %c0_34] : memref<64x384xf32, #tpu.memory_space<vmem>>, vector<8x384xf32>
    %cst_35 = arith.constant dense<0.000000e+00> : vector<8x384xf32>
    %148 = tpu.matmul %141, %3, %cst_35 {dimension_numbers = #tpu.dot_dimension_numbers<[1], [0], [0], [1], [0, 0, 1, 1], [], []>} : vector<8x128xf32>, vector<128x384xf32>, vector<8x384xf32> -> vector<8x384xf32>
    %149 = vector.extract_strided_slice %147 {offsets = [0, 0], sizes = [8, 128], strides = [1, 1]} : vector<8x384xf32> to vector<8x128xf32>
    %150 = vector.extract_strided_slice %148 {offsets = [0, 0], sizes = [8, 128], strides = [1, 1]} : vector<8x384xf32> to vector<8x128xf32>
    %151 = arith.addf %149, %150 : vector<8x128xf32>
    %152 = arith.negf %151 : vector<8x128xf32>
    %153 = math.exp %152 : vector<8x128xf32>
    %cst_36 = arith.constant 1.000000e+00 : f32
    %154 = vector.broadcast %cst_36 : f32 to vector<8x128xf32>
    %155 = arith.addf %154, %153 : vector<8x128xf32>
    %156 = arith.divf %154, %155 : vector<8x128xf32>
    %157 = vector.extract_strided_slice %147 {offsets = [0, 128], sizes = [8, 128], strides = [1, 1]} : vector<8x384xf32> to vector<8x128xf32>
    %158 = vector.extract_strided_slice %148 {offsets = [0, 128], sizes = [8, 128], strides = [1, 1]} : vector<8x384xf32> to vector<8x128xf32>
    %159 = arith.addf %157, %158 : vector<8x128xf32>
    %160 = arith.negf %159 : vector<8x128xf32>
    %161 = math.exp %160 : vector<8x128xf32>
    %cst_37 = arith.constant 1.000000e+00 : f32
    %162 = vector.broadcast %cst_37 : f32 to vector<8x128xf32>
    %163 = arith.addf %162, %161 : vector<8x128xf32>
    %164 = arith.divf %162, %163 : vector<8x128xf32>
    %165 = vector.extract_strided_slice %147 {offsets = [0, 256], sizes = [8, 128], strides = [1, 1]} : vector<8x384xf32> to vector<8x128xf32>
    %166 = vector.extract_strided_slice %148 {offsets = [0, 256], sizes = [8, 128], strides = [1, 1]} : vector<8x384xf32> to vector<8x128xf32>
    %167 = arith.addf %166, %6 : vector<8x128xf32>
    %168 = arith.mulf %156, %167 : vector<8x128xf32>
    %169 = arith.addf %165, %168 : vector<8x128xf32>
    %170 = math.tanh %169 : vector<8x128xf32>
    %cst_38 = arith.constant 1.000000e+00 : f32
    %171 = vector.broadcast %cst_38 : f32 to vector<8x128xf32>
    %172 = arith.subf %171, %164 : vector<8x128xf32>
    %173 = arith.mulf %172, %170 : vector<8x128xf32>
    %174 = arith.mulf %164, %141 : vector<8x128xf32>
    %175 = arith.addf %173, %174 : vector<8x128xf32>
    %176 = arith.index_cast %145 : i32 to index
    %c0_39 = arith.constant 0 : index
    %177 = vector.load %arg4[%176, %c0_39] : memref<64x128xf32, #tpu.memory_space<vmem>>, vector<8x128xf32>
    tpu.vector_store %arg4[%176, %c0_39], %175 {strides = array<i32>} : memref<64x128xf32, #tpu.memory_space<vmem>>, vector<8x128xf32>,
    %c5_i32 = arith.constant 5 : i32
    %c8_i32_40 = arith.constant 8 : i32
    %178 = arith.muli %c5_i32, %c8_i32_40 : i32
    %179 = tpu.assume_multiple %178, 8 : i32
    %180 = arith.index_cast %179 : i32 to index
    %c0_41 = arith.constant 0 : index
    %181 = vector.load %arg1[%180, %c0_41] : memref<64x384xf32, #tpu.memory_space<vmem>>, vector<8x384xf32>
    %cst_42 = arith.constant dense<0.000000e+00> : vector<8x384xf32>
    %182 = tpu.matmul %175, %3, %cst_42 {dimension_numbers = #tpu.dot_dimension_numbers<[1], [0], [0], [1], [0, 0, 1, 1], [], []>} : vector<8x128xf32>, vector<128x384xf32>, vector<8x384xf32> -> vector<8x384xf32>
    %183 = vector.extract_strided_slice %181 {offsets = [0, 0], sizes = [8, 128], strides = [1, 1]} : vector<8x384xf32> to vector<8x128xf32>
    %184 = vector.extract_strided_slice %182 {offsets = [0, 0], sizes = [8, 128], strides = [1, 1]} : vector<8x384xf32> to vector<8x128xf32>
    %185 = arith.addf %183, %184 : vector<8x128xf32>
    %186 = arith.negf %185 : vector<8x128xf32>
    %187 = math.exp %186 : vector<8x128xf32>
    %cst_43 = arith.constant 1.000000e+00 : f32
    %188 = vector.broadcast %cst_43 : f32 to vector<8x128xf32>
    %189 = arith.addf %188, %187 : vector<8x128xf32>
    %190 = arith.divf %188, %189 : vector<8x128xf32>
    %191 = vector.extract_strided_slice %181 {offsets = [0, 128], sizes = [8, 128], strides = [1, 1]} : vector<8x384xf32> to vector<8x128xf32>
    %192 = vector.extract_strided_slice %182 {offsets = [0, 128], sizes = [8, 128], strides = [1, 1]} : vector<8x384xf32> to vector<8x128xf32>
    %193 = arith.addf %191, %192 : vector<8x128xf32>
    %194 = arith.negf %193 : vector<8x128xf32>
    %195 = math.exp %194 : vector<8x128xf32>
    %cst_44 = arith.constant 1.000000e+00 : f32
    %196 = vector.broadcast %cst_44 : f32 to vector<8x128xf32>
    %197 = arith.addf %196, %195 : vector<8x128xf32>
    %198 = arith.divf %196, %197 : vector<8x128xf32>
    %199 = vector.extract_strided_slice %181 {offsets = [0, 256], sizes = [8, 128], strides = [1, 1]} : vector<8x384xf32> to vector<8x128xf32>
    %200 = vector.extract_strided_slice %182 {offsets = [0, 256], sizes = [8, 128], strides = [1, 1]} : vector<8x384xf32> to vector<8x128xf32>
    %201 = arith.addf %200, %6 : vector<8x128xf32>
    %202 = arith.mulf %190, %201 : vector<8x128xf32>
    %203 = arith.addf %199, %202 : vector<8x128xf32>
    %204 = math.tanh %203 : vector<8x128xf32>
    %cst_45 = arith.constant 1.000000e+00 : f32
    %205 = vector.broadcast %cst_45 : f32 to vector<8x128xf32>
    %206 = arith.subf %205, %198 : vector<8x128xf32>
    %207 = arith.mulf %206, %204 : vector<8x128xf32>
    %208 = arith.mulf %198, %175 : vector<8x128xf32>
    %209 = arith.addf %207, %208 : vector<8x128xf32>
    %210 = arith.index_cast %179 : i32 to index
    %c0_46 = arith.constant 0 : index
    %211 = vector.load %arg4[%210, %c0_46] : memref<64x128xf32, #tpu.memory_space<vmem>>, vector<8x128xf32>
    tpu.vector_store %arg4[%210, %c0_46], %209 {strides = array<i32>} : memref<64x128xf32, #tpu.memory_space<vmem>>, vector<8x128xf32>,
    %c6_i32 = arith.constant 6 : i32
    %c8_i32_47 = arith.constant 8 : i32
    %212 = arith.muli %c6_i32, %c8_i32_47 : i32
    %213 = tpu.assume_multiple %212, 8 : i32
    %214 = arith.index_cast %213 : i32 to index
    %c0_48 = arith.constant 0 : index
    %215 = vector.load %arg1[%214, %c0_48] : memref<64x384xf32, #tpu.memory_space<vmem>>, vector<8x384xf32>
    %cst_49 = arith.constant dense<0.000000e+00> : vector<8x384xf32>
    %216 = tpu.matmul %209, %3, %cst_49 {dimension_numbers = #tpu.dot_dimension_numbers<[1], [0], [0], [1], [0, 0, 1, 1], [], []>} : vector<8x128xf32>, vector<128x384xf32>, vector<8x384xf32> -> vector<8x384xf32>
    %217 = vector.extract_strided_slice %215 {offsets = [0, 0], sizes = [8, 128], strides = [1, 1]} : vector<8x384xf32> to vector<8x128xf32>
    %218 = vector.extract_strided_slice %216 {offsets = [0, 0], sizes = [8, 128], strides = [1, 1]} : vector<8x384xf32> to vector<8x128xf32>
    %219 = arith.addf %217, %218 : vector<8x128xf32>
    %220 = arith.negf %219 : vector<8x128xf32>
    %221 = math.exp %220 : vector<8x128xf32>
    %cst_50 = arith.constant 1.000000e+00 : f32
    %222 = vector.broadcast %cst_50 : f32 to vector<8x128xf32>
    %223 = arith.addf %222, %221 : vector<8x128xf32>
    %224 = arith.divf %222, %223 : vector<8x128xf32>
    %225 = vector.extract_strided_slice %215 {offsets = [0, 128], sizes = [8, 128], strides = [1, 1]} : vector<8x384xf32> to vector<8x128xf32>
    %226 = vector.extract_strided_slice %216 {offsets = [0, 128], sizes = [8, 128], strides = [1, 1]} : vector<8x384xf32> to vector<8x128xf32>
    %227 = arith.addf %225, %226 : vector<8x128xf32>
    %228 = arith.negf %227 : vector<8x128xf32>
    %229 = math.exp %228 : vector<8x128xf32>
    %cst_51 = arith.constant 1.000000e+00 : f32
    %230 = vector.broadcast %cst_51 : f32 to vector<8x128xf32>
    %231 = arith.addf %230, %229 : vector<8x128xf32>
    %232 = arith.divf %230, %231 : vector<8x128xf32>
    %233 = vector.extract_strided_slice %215 {offsets = [0, 256], sizes = [8, 128], strides = [1, 1]} : vector<8x384xf32> to vector<8x128xf32>
    %234 = vector.extract_strided_slice %216 {offsets = [0, 256], sizes = [8, 128], strides = [1, 1]} : vector<8x384xf32> to vector<8x128xf32>
    %235 = arith.addf %234, %6 : vector<8x128xf32>
    %236 = arith.mulf %224, %235 : vector<8x128xf32>
    %237 = arith.addf %233, %236 : vector<8x128xf32>
    %238 = math.tanh %237 : vector<8x128xf32>
    %cst_52 = arith.constant 1.000000e+00 : f32
    %239 = vector.broadcast %cst_52 : f32 to vector<8x128xf32>
    %240 = arith.subf %239, %232 : vector<8x128xf32>
    %241 = arith.mulf %240, %238 : vector<8x128xf32>
    %242 = arith.mulf %232, %209 : vector<8x128xf32>
    %243 = arith.addf %241, %242 : vector<8x128xf32>
    %244 = arith.index_cast %213 : i32 to index
    %c0_53 = arith.constant 0 : index
    %245 = vector.load %arg4[%244, %c0_53] : memref<64x128xf32, #tpu.memory_space<vmem>>, vector<8x128xf32>
    tpu.vector_store %arg4[%244, %c0_53], %243 {strides = array<i32>} : memref<64x128xf32, #tpu.memory_space<vmem>>, vector<8x128xf32>,
    %c7_i32 = arith.constant 7 : i32
    %c8_i32_54 = arith.constant 8 : i32
    %246 = arith.muli %c7_i32, %c8_i32_54 : i32
    %247 = tpu.assume_multiple %246, 8 : i32
    %248 = arith.index_cast %247 : i32 to index
    %c0_55 = arith.constant 0 : index
    %249 = vector.load %arg1[%248, %c0_55] : memref<64x384xf32, #tpu.memory_space<vmem>>, vector<8x384xf32>
    %cst_56 = arith.constant dense<0.000000e+00> : vector<8x384xf32>
    %250 = tpu.matmul %243, %3, %cst_56 {dimension_numbers = #tpu.dot_dimension_numbers<[1], [0], [0], [1], [0, 0, 1, 1], [], []>} : vector<8x128xf32>, vector<128x384xf32>, vector<8x384xf32> -> vector<8x384xf32>
    %251 = vector.extract_strided_slice %249 {offsets = [0, 0], sizes = [8, 128], strides = [1, 1]} : vector<8x384xf32> to vector<8x128xf32>
    %252 = vector.extract_strided_slice %250 {offsets = [0, 0], sizes = [8, 128], strides = [1, 1]} : vector<8x384xf32> to vector<8x128xf32>
    %253 = arith.addf %251, %252 : vector<8x128xf32>
    %254 = arith.negf %253 : vector<8x128xf32>
    %255 = math.exp %254 : vector<8x128xf32>
    %cst_57 = arith.constant 1.000000e+00 : f32
    %256 = vector.broadcast %cst_57 : f32 to vector<8x128xf32>
    %257 = arith.addf %256, %255 : vector<8x128xf32>
    %258 = arith.divf %256, %257 : vector<8x128xf32>
    %259 = vector.extract_strided_slice %249 {offsets = [0, 128], sizes = [8, 128], strides = [1, 1]} : vector<8x384xf32> to vector<8x128xf32>
    %260 = vector.extract_strided_slice %250 {offsets = [0, 128], sizes = [8, 128], strides = [1, 1]} : vector<8x384xf32> to vector<8x128xf32>
    %261 = arith.addf %259, %260 : vector<8x128xf32>
    %262 = arith.negf %261 : vector<8x128xf32>
    %263 = math.exp %262 : vector<8x128xf32>
    %cst_58 = arith.constant 1.000000e+00 : f32
    %264 = vector.broadcast %cst_58 : f32 to vector<8x128xf32>
    %265 = arith.addf %264, %263 : vector<8x128xf32>
    %266 = arith.divf %264, %265 : vector<8x128xf32>
    %267 = vector.extract_strided_slice %249 {offsets = [0, 256], sizes = [8, 128], strides = [1, 1]} : vector<8x384xf32> to vector<8x128xf32>
    %268 = vector.extract_strided_slice %250 {offsets = [0, 256], sizes = [8, 128], strides = [1, 1]} : vector<8x384xf32> to vector<8x128xf32>
    %269 = arith.addf %268, %6 : vector<8x128xf32>
    %270 = arith.mulf %258, %269 : vector<8x128xf32>
    %271 = arith.addf %267, %270 : vector<8x128xf32>
    %272 = math.tanh %271 : vector<8x128xf32>
    %cst_59 = arith.constant 1.000000e+00 : f32
    %273 = vector.broadcast %cst_59 : f32 to vector<8x128xf32>
    %274 = arith.subf %273, %266 : vector<8x128xf32>
    %275 = arith.mulf %274, %272 : vector<8x128xf32>
    %276 = arith.mulf %266, %243 : vector<8x128xf32>
    %277 = arith.addf %275, %276 : vector<8x128xf32>
    %278 = arith.index_cast %247 : i32 to index
    %c0_60 = arith.constant 0 : index
    %279 = vector.load %arg4[%278, %c0_60] : memref<64x128xf32, #tpu.memory_space<vmem>>, vector<8x128xf32>
    tpu.vector_store %arg4[%278, %c0_60], %277 {strides = array<i32>} : memref<64x128xf32, #tpu.memory_space<vmem>>, vector<8x128xf32>,
    %c8_i32_61 = arith.constant 8 : i32
    %c0_62 = arith.constant 0 : index
    %c0_63 = arith.constant 0 : index
    %280 = vector.load %arg5[%c0_62, %c0_63] : memref<8x128xf32, #tpu.memory_space<vmem>>, vector<8x128xf32>
    tpu.vector_store %arg5[%c0_62, %c0_63], %277 {strides = array<i32>} : memref<8x128xf32, #tpu.memory_space<vmem>>, vector<8x128xf32>,
    return
  }
  func.func @transform_0(%arg0: i32) -> (i32, i32) {
    %c0_i32 = arith.constant 0 : i32
    %c0_i32_0 = arith.constant 0 : i32
    return %arg0, %c0_i32 : i32, i32
  }
  func.func @transform_1(%arg0: i32) -> (i32, i32) {
    %c0_i32 = arith.constant 0 : i32
    %c0_i32_0 = arith.constant 0 : i32
    %c0_i32_1 = arith.constant 0 : i32
    return %c0_i32, %c0_i32_0 : i32, i32
  }
  func.func @transform_2(%arg0: i32) -> (i32, i32) {
    %c0_i32 = arith.constant 0 : i32
    %c0_i32_0 = arith.constant 0 : i32
    %c0_i32_1 = arith.constant 0 : i32
    return %c0_i32, %c0_i32_0 : i32, i32
  }
  func.func @transform_3(%arg0: i32) -> (i32, i32) {
    %c0_i32 = arith.constant 0 : i32
    %c0_i32_0 = arith.constant 0 : i32
    return %arg0, %c0_i32 : i32, i32
  }
}

</mosaic_0001>

<bundles_post_ra>
// kernel: decoder_rnn_forward.5
= control target key start
LH: loop header
LB: loop body
LE: loop exit
PB: predicated region body
PF: predicated region fallthrough
CT: control target
= control target key end

     0   :  { %s382_s1 = inlined_call_operand.vmem [shape: f32[128,128], index: 1, kind: input, shape index: {}]   ;;  %s383_s0 = inlined_call_operand.vmem [shape: f32[64,128], index: 0, kind: input, shape index: {}]   ;;  %s384_s2 = inlined_call_operand.vmem [shape: f32[1,128], index: 2, kind: input, shape index: {}]   ;;  %s385_s3 = inlined_call_operand.vmem [shape: f32[64,128], index: 3, kind: output, shape index: {}]  }
   0x1   :  { %v37_v0 = vld [vmem:[%s382_s1 + $0x78] sm:$0xff]  ;;  %v36_v1 = vld [vmem:[%s382_s1 + $0x70] sm:$0xff]  ;;  %v35_v2 = vld [vmem:[%s382_s1 + $0x68] sm:$0xff] }
   0x2   :  { %187 = vmatprep.subr.mxu0 %v37_v0  ;;  %231 = vmatprep.subr.mxu1 %v37_v0  ;;  %v34_v3 = vld [vmem:[%s382_s1 + $0x60] sm:$0xff]  ;;  %v33_v4 = vld [vmem:[%s382_s1 + $0x58] sm:$0xff]  ;;  %v32_v5 = vld [vmem:[%s382_s1 + $0x50] sm:$0xff] }
   0x3   :  { %188 = vmatpush3.msra.mxu0 %v37_v0  ;;  %247 = vmatpush3.msra.mxu1 %v37_v0  ;;  %v31_v6 = vld [vmem:[%s382_s1 + $0x48] sm:$0xff]  ;;  %v30_v7 = vld [vmem:[%s382_s1 + $0x40] sm:$0xff]  ;;  %v29_v8 = vld [vmem:[%s382_s1 + $0x38] sm:$0xff] }
   0x4   :  { %189 = vmatprep.subr.mxu0 %v36_v1  ;;  %232 = vmatprep.subr.mxu1 %v36_v1  ;;  %v28_v9 = vld [vmem:[%s382_s1 + $0x30] sm:$0xff]  ;;  %v27_v10 = vld [vmem:[%s382_s1 + $0x28] sm:$0xff]  ;;  %v26_v11 = vld [vmem:[%s382_s1 + $0x20] sm:$0xff] }
   0x5   :  { %190 = vmatpush3.msra.mxu0 %v36_v1  ;;  %248 = vmatpush3.msra.mxu1 %v36_v1  ;;  %v25_v12 = vld [vmem:[%s382_s1 + $0x18] sm:$0xff]  ;;  %v24_v13 = vld [vmem:[%s382_s1 + $0x10] sm:$0xff]  ;;  %v23_v14 = vld [vmem:[%s382_s1 + $0x8] sm:$0xff] }
   0x6   :  { %191 = vmatprep.subr.mxu0 %v35_v2  ;;  %233 = vmatprep.subr.mxu1 %v35_v2  ;;  %v22_v15 = vld [vmem:[%s382_s1] sm:$0xff]  ;;  %v15_v18 = vld [vmem:[%s383_s0 + $0x8] sm:$0xff]  ;;  %v16_v20 = vld [vmem:[%s383_s0 + $0x10] sm:$0xff] }
   0x7   :  { %192 = vmatpush3.msra.mxu0 %v35_v2  ;;  %249 = vmatpush3.msra.mxu1 %v35_v2  ;;  %v14_v16 = vld [vmem:[%s383_s0] sm:$0xff]  ;;  %v19_v19 = vld [vmem:[%s383_s0 + $0x28] sm:$0xff]  ;;  %v20_v21 = vld [vmem:[%s383_s0 + $0x30] sm:$0xff] }
   0x8   :  { %193 = vmatprep.subr.mxu0 %v34_v3  ;;  %234 = vmatprep.subr.mxu1 %v34_v3  ;;  %v18_v17 = vld [vmem:[%s383_s0 + $0x20] sm:$0xff]  ;;  %v17_v22 = vld [vmem:[%s383_s0 + $0x18] sm:$0xff] }
   0x9   :  { %194 = vmatpush3.msra.mxu0 %v34_v3  ;;  %250 = vmatpush3.msra.mxu1 %v34_v3  ;;  %v21_v23 = vld [vmem:[%s383_s0 + $0x38] sm:$0xff]  ;;  %v162_v24 = vld [vmem:[%s384_s2] ss:$0 sm:$0xff] }
   0xa   :  { %195 = vmatprep.subr.mxu0 %v33_v4  ;;  %235 = vmatprep.subr.mxu1 %v33_v4 }
   0xb   :  { %196 = vmatpush3.msra.mxu0 %v33_v4  ;;  %251 = vmatpush3.msra.mxu1 %v33_v4 }
   0xc   :  { %197 = vmatprep.subr.mxu0 %v32_v5  ;;  %236 = vmatprep.subr.mxu1 %v32_v5 }
   0xd   :  { %198 = vmatpush3.msra.mxu0 %v32_v5  ;;  %252 = vmatpush3.msra.mxu1 %v32_v5 }
   0xe   :  { %199 = vmatprep.subr.mxu0 %v31_v6  ;;  %237 = vmatprep.subr.mxu1 %v31_v6 }
   0xf   :  { %200 = vmatpush3.msra.mxu0 %v31_v6  ;;  %253 = vmatpush3.msra.mxu1 %v31_v6 }
  0x10   :  { %201 = vmatprep.subr.mxu0 %v30_v7  ;;  %238 = vmatprep.subr.mxu1 %v30_v7 }
  0x11   :  { %202 = vmatpush3.msra.mxu0 %v30_v7  ;;  %254 = vmatpush3.msra.mxu1 %v30_v7 }
  0x12   :  { %203 = vmatprep.subr.mxu0 %v29_v8  ;;  %239 = vmatprep.subr.mxu1 %v29_v8 }
  0x13   :  { %204 = vmatpush3.msra.mxu0 %v29_v8  ;;  %255 = vmatpush3.msra.mxu1 %v29_v8 }
  0x14   :  { %205 = vmatprep.subr.mxu0 %v28_v9  ;;  %240 = vmatprep.subr.mxu1 %v28_v9 }
  0x15   :  { %206 = vmatpush3.msra.mxu0 %v28_v9  ;;  %256 = vmatpush3.msra.mxu1 %v28_v9 }
  0x16   :  { %207 = vmatprep.subr.mxu0 %v27_v10  ;;  %241 = vmatprep.subr.mxu1 %v27_v10 }
  0x17   :  { %208 = vmatpush3.msra.mxu0 %v27_v10  ;;  %257 = vmatpush3.msra.mxu1 %v27_v10 }
  0x18   :  { %209 = vmatprep.subr.mxu0 %v26_v11  ;;  %242 = vmatprep.subr.mxu1 %v26_v11 }
  0x19   :  { %210 = vmatpush3.msra.mxu0 %v26_v11  ;;  %258 = vmatpush3.msra.mxu1 %v26_v11 }
  0x1a   :  { %211 = vmatprep.subr.mxu0 %v25_v12  ;;  %243 = vmatprep.subr.mxu1 %v25_v12 }
  0x1b   :  { %212 = vmatpush3.msra.mxu0 %v25_v12  ;;  %259 = vmatpush3.msra.mxu1 %v25_v12 }
  0x1c   :  { %213 = vmatprep.subr.mxu0 %v24_v13  ;;  %244 = vmatprep.subr.mxu1 %v24_v13 }
  0x1d   :  { %214 = vmatpush3.msra.mxu0 %v24_v13  ;;  %260 = vmatpush3.msra.mxu1 %v24_v13 }
  0x1e   :  { %215 = vmatprep.subr.mxu0 %v23_v14  ;;  %245 = vmatprep.subr.mxu1 %v23_v14 }
  0x1f   :  { %216 = vmatpush3.msra.mxu0 %v23_v14  ;;  %261 = vmatpush3.msra.mxu1 %v23_v14 }
  0x20   :  { %217 = vmatprep.subr.mxu0 %v22_v15  ;;  %246 = vmatprep.subr.mxu1 %v22_v15 }
  0x21   :  { %218 = vmatpush3.msra.mxu0 %v22_v15  ;;  %262 = vmatpush3.msra.mxu1 %v22_v15 }
  0x22   :  { %219 = vmatprep.mubr.f32.mxu0 %v14_v16  ;;  %225 = vmatprep.mubr.f32.mxu1 %v18_v17 }
  0x23   :  { %220 = vmatmul.mubr.f32.vlgmr.msra.gmra.mxu0 %v15_v18  ;;  %226 = vmatmul.mubr.f32.vlgmr.msra.gmra.mxu1 %v19_v19 }
  0x24   :  { %222 = vmatprep.mubr.f32.mxu0 %v16_v20  ;;  %228 = vmatprep.mubr.f32.mxu1 %v20_v21 }
  0x27   :  { %223 = vmatmul.mubr.f32.gmra.mxu0 %v17_v22  ;;  %229 = vmatmul.mubr.f32.gmra.mxu1 %v21_v23 }
  0xe3   :  { %v221_v25 = vpop.f32.mrf.mxu0  ;;  %v227_v26 = vpop.f32.mrf.mxu1 }
  0xe4   :  { %v117_v27 = vadd.f32 %v221_v25, %v162_v24  ;;  %v137_v28 = vadd.f32 %v227_v26, %v162_v24 }
  0xe5   :  { %v111_v29 = vpop.f32.mrf.mxu0  ;;  %v131_v30 = vpop.f32.mrf.mxu1 }
  0xe6   :  { %151 = vst [vmem:[%s385_s3 + $0x8] sm:$0xff] %v117_v27  ;;  %155 = vst [vmem:[%s385_s3 + $0x28] sm:$0xff] %v137_v28  ;;  %v112_v31 = vadd.f32 %v162_v24, %v111_v29  ;;  %v132_v32 = vadd.f32 %v162_v24, %v131_v30 }
  0xe7   :  { %v224_v33 = vpop.f32.mrf.mxu0  ;;  %v230_v34 = vpop.f32.mrf.mxu1 }
  0xe8   :  { %150 = vst [vmem:[%s385_s3] sm:$0xff] %v112_v31  ;;  %154 = vst [vmem:[%s385_s3 + $0x20] sm:$0xff] %v132_v32  ;;  %v127_v35 = vadd.f32 %v224_v33, %v162_v24  ;;  %v147_v36 = vadd.f32 %v230_v34, %v162_v24 }
  0xe9   :  { %v121_v37 = vpop.f32.mrf.mxu0  ;;  %v141_v38 = vpop.f32.mrf.mxu1 }
  0xea   :  { %153 = vst [vmem:[%s385_s3 + $0x18] sm:$0xff] %v127_v35  ;;  %157 = vst [vmem:[%s385_s3 + $0x38] sm:$0xff] %v147_v36  ;;  %v122_v39 = vadd.f32 %v162_v24, %v121_v37  ;;  %v142_v40 = vadd.f32 %v162_v24, %v141_v38 }
  0xec   :  { %152 = vst [vmem:[%s385_s3 + $0x10] sm:$0xff] %v122_v39  ;;  %156 = vst [vmem:[%s385_s3 + $0x30] sm:$0xff] %v142_v40 }

// kernel: decoder_rnn_forward.3
= control target key start
LH: loop header
LB: loop body
LE: loop exit
PB: predicated region body
PF: predicated region fallthrough
CT: control target
= control target key end

     0   :  { %v402_v3 = vmov 0.0   ;;  %v72_v57 = vlaneseq  ;;  %s694_s1 = inlined_call_operand.vmem [shape: f32[128,384], index: 1, kind: input, shape index: {}]   ;;  %s695_s0 = inlined_call_operand.vmem [shape: f32[64,128], index: 0, kind: input, shape index: {}]   ;;  %s696_s2 = inlined_call_operand.vmem [shape: f32[1,384], index: 2, kind: input, shape index: {}]   ;;  %s697_s3 = inlined_call_operand.vmem [shape: f32[64,384], index: 3, kind: output, shape index: {}]  }
   0x1   :  { %v68_v0 = vld [vmem:[%s694_s1 + $0x170] sm:$0xff]  ;;  %v67_v1 = vld [vmem:[%s694_s1 + $0x168] sm:$0xff]  ;;  %v65_v2 = vld [vmem:[%s694_s1 + $0x158] sm:$0xff]  ;;  %151 = vmatprep.mubr.f32.mxu0 %v402_v3 }
   0x2   :  { %87 = vmatprep.subr.mxu0 %v68_v0  ;;  %v64_v4 = vld [vmem:[%s694_s1 + $0x150] sm:$0xff]  ;;  %v62_v5 = vld [vmem:[%s694_s1 + $0x140] sm:$0xff]  ;;  %v61_v6 = vld [vmem:[%s694_s1 + $0x138] sm:$0xff]  ;;  %v73_v58 = vshrl.u32 %v72_v57, 7 }
   0x3   :  { %88 = vmatpush1.msra.mxu0 %v67_v1  ;;  %v59_v7 = vld [vmem:[%s694_s1 + $0x128] sm:$0xff]  ;;  %v58_v8 = vld [vmem:[%s694_s1 + $0x120] sm:$0xff]  ;;  %v69_v9 = vld [vmem:[%s694_s1 + $0x178] sm:$0xff] }
   0x4   :  { %89 = vmatprep.subr.mxu0 %v65_v2  ;;  %v56_v10 = vld [vmem:[%s694_s1 + $0x110] sm:$0xff]  ;;  %357 = vmatprep.subr.mxu1 %v69_v9  ;;  %v66_v11 = vld [vmem:[%s694_s1 + $0x160] sm:$0xff]  ;;  %v55_v12 = vld [vmem:[%s694_s1 + $0x108] sm:$0xff]  ;;  %v74_v59 = vsub.s32 0, %v73_v58  ;;  %v78_v61 = vsub.s32 1, %v73_v58  ;;  %v82_v63 = vsub.s32 2, %v73_v58 }
   0x5   :  { %90 = vmatpush1.msra.mxu0 %v64_v4  ;;  %358 = vmatpush3.msra.mxu1 %v69_v9  ;;  %v63_v13 = vld [vmem:[%s694_s1 + $0x148] sm:$0xff]  ;;  %v53_v14 = vld [vmem:[%s694_s1 + $0xf8] sm:$0xff]  ;;  %v52_v15 = vld [vmem:[%s694_s1 + $0xf0] sm:$0xff] }
   0x6   :  { %91 = vmatprep.subr.mxu0 %v62_v5  ;;  %359 = vmatprep.subr.mxu1 %v66_v11  ;;  %v60_v16 = vld [vmem:[%s694_s1 + $0x130] sm:$0xff]  ;;  %v50_v17 = vld [vmem:[%s694_s1 + $0xe0] sm:$0xff]  ;;  %v49_v18 = vld [vmem:[%s694_s1 + $0xd8] sm:$0xff] }
   0x7   :  { %92 = vmatpush1.msra.mxu0 %v61_v6  ;;  %360 = vmatpush3.msra.mxu1 %v66_v11  ;;  %v57_v19 = vld [vmem:[%s694_s1 + $0x118] sm:$0xff]  ;;  %v47_v20 = vld [vmem:[%s694_s1 + $0xc8] sm:$0xff]  ;;  %v46_v21 = vld [vmem:[%s694_s1 + $0xc0] sm:$0xff] }
   0x8   :  { %93 = vmatprep.subr.mxu0 %v59_v7  ;;  %361 = vmatprep.subr.mxu1 %v63_v13  ;;  %v54_v22 = vld [vmem:[%s694_s1 + $0x100] sm:$0xff]  ;;  %v44_v23 = vld [vmem:[%s694_s1 + $0xb0] sm:$0xff]  ;;  %v43_v24 = vld [vmem:[%s694_s1 + $0xa8] sm:$0xff] }
   0x9   :  { %94 = vmatpush1.msra.mxu0 %v58_v8  ;;  %362 = vmatpush3.msra.mxu1 %v63_v13  ;;  %v51_v25 = vld [vmem:[%s694_s1 + $0xe8] sm:$0xff]  ;;  %v41_v26 = vld [vmem:[%s694_s1 + $0x98] sm:$0xff]  ;;  %v40_v27 = vld [vmem:[%s694_s1 + $0x90] sm:$0xff] }
   0xa   :  { %95 = vmatprep.subr.mxu0 %v56_v10  ;;  %363 = vmatprep.subr.mxu1 %v60_v16  ;;  %v48_v28 = vld [vmem:[%s694_s1 + $0xd0] sm:$0xff]  ;;  %v38_v29 = vld [vmem:[%s694_s1 + $0x80] sm:$0xff]  ;;  %v37_v30 = vld [vmem:[%s694_s1 + $0x78] sm:$0xff] }
   0xb   :  { %96 = vmatpush1.msra.mxu0 %v55_v12  ;;  %364 = vmatpush3.msra.mxu1 %v60_v16  ;;  %v45_v31 = vld [vmem:[%s694_s1 + $0xb8] sm:$0xff]  ;;  %v35_v32 = vld [vmem:[%s694_s1 + $0x68] sm:$0xff]  ;;  %v34_v33 = vld [vmem:[%s694_s1 + $0x60] sm:$0xff] }
   0xc   :  { %97 = vmatprep.subr.mxu0 %v53_v14  ;;  %365 = vmatprep.subr.mxu1 %v57_v19  ;;  %v42_v34 = vld [vmem:[%s694_s1 + $0xa0] sm:$0xff]  ;;  %v32_v35 = vld [vmem:[%s694_s1 + $0x50] sm:$0xff]  ;;  %v31_v36 = vld [vmem:[%s694_s1 + $0x48] sm:$0xff] }
   0xd   :  { %98 = vmatpush1.msra.mxu0 %v52_v15  ;;  %366 = vmatpush3.msra.mxu1 %v57_v19  ;;  %v39_v37 = vld [vmem:[%s694_s1 + $0x88] sm:$0xff]  ;;  %v29_v38 = vld [vmem:[%s694_s1 + $0x38] sm:$0xff]  ;;  %v28_v39 = vld [vmem:[%s694_s1 + $0x30] sm:$0xff] }
   0xe   :  { %99 = vmatprep.subr.mxu0 %v50_v17  ;;  %367 = vmatprep.subr.mxu1 %v54_v22  ;;  %v36_v40 = vld [vmem:[%s694_s1 + $0x70] sm:$0xff]  ;;  %v26_v41 = vld [vmem:[%s694_s1 + $0x20] sm:$0xff]  ;;  %v25_v42 = vld [vmem:[%s694_s1 + $0x18] sm:$0xff] }
   0xf   :  { %100 = vmatpush1.msra.mxu0 %v49_v18  ;;  %368 = vmatpush3.msra.mxu1 %v54_v22  ;;  %v33_v43 = vld [vmem:[%s694_s1 + $0x58] sm:$0xff]  ;;  %v23_v44 = vld [vmem:[%s694_s1 + $0x8] sm:$0xff]  ;;  %v22_v45 = vld [vmem:[%s694_s1] sm:$0xff] }
  0x10   :  { %101 = vmatprep.subr.mxu0 %v47_v20  ;;  %369 = vmatprep.subr.mxu1 %v51_v25  ;;  %v30_v46 = vld [vmem:[%s694_s1 + $0x40] sm:$0xff]  ;;  %v27_v48 = vld [vmem:[%s694_s1 + $0x28] sm:$0xff]  ;;  %v24_v49 = vld [vmem:[%s694_s1 + $0x10] sm:$0xff] }
  0x11   :  { %102 = vmatpush1.msra.mxu0 %v46_v21  ;;  %370 = vmatpush3.msra.mxu1 %v51_v25  ;;  %v14_v47 = vld [vmem:[%s695_s0] sm:$0xff]  ;;  %v15_v50 = vld [vmem:[%s695_s0 + $0x8] sm:$0xff]  ;;  %v16_v51 = vld [vmem:[%s695_s0 + $0x10] sm:$0xff] }
  0x12   :  { %103 = vmatprep.subr.mxu0 %v44_v23  ;;  %371 = vmatprep.subr.mxu1 %v48_v28  ;;  %v17_v52 = vld [vmem:[%s695_s0 + $0x18] sm:$0xff]  ;;  %v18_v53 = vld [vmem:[%s695_s0 + $0x20] sm:$0xff]  ;;  %v20_v54 = vld [vmem:[%s695_s0 + $0x30] sm:$0xff] }
  0x13   :  { %104 = vmatpush1.msra.mxu0 %v43_v24  ;;  %372 = vmatpush3.msra.mxu1 %v48_v28  ;;  %v19_v55 = vld [vmem:[%s695_s0 + $0x28] sm:$0xff]  ;;  %v21_v56 = vld [vmem:[%s695_s0 + $0x38] sm:$0xff]  ;;  %v70_v60 = vld [vmem:[%s696_s2] sm:$0x7] }
  0x14   :  { %105 = vmatprep.subr.mxu0 %v41_v26  ;;  %373 = vmatprep.subr.mxu1 %v45_v31  ;;  %v602_v62 = vrot.slane %v70_v60, %v74_v59  ;;  %v604_v0 = vrot.slane %v70_v60, %v78_v61  ;;  %v83_v5 = vrot.slane %v70_v60, %v82_v63 }
  0x15   :  { %106 = vmatpush1.msra.mxu0 %v40_v27  ;;  %374 = vmatpush3.msra.mxu1 %v45_v31 }
  0x16   :  { %107 = vmatprep.subr.mxu0 %v38_v29  ;;  %375 = vmatprep.subr.mxu1 %v42_v34 }
  0x17   :  { %108 = vmatpush1.msra.mxu0 %v37_v30  ;;  %376 = vmatpush3.msra.mxu1 %v42_v34 }
  0x18   :  { %109 = vmatprep.subr.mxu0 %v35_v32  ;;  %377 = vmatprep.subr.mxu1 %v39_v37 }
  0x19   :  { %110 = vmatpush1.msra.mxu0 %v34_v33  ;;  %378 = vmatpush3.msra.mxu1 %v39_v37 }
  0x1a   :  { %111 = vmatprep.subr.mxu0 %v32_v35  ;;  %379 = vmatprep.subr.mxu1 %v36_v40 }
  0x1b   :  { %112 = vmatpush1.msra.mxu0 %v31_v36  ;;  %380 = vmatpush3.msra.mxu1 %v36_v40 }
  0x1c   :  { %113 = vmatprep.subr.mxu0 %v29_v38  ;;  %381 = vmatprep.subr.mxu1 %v33_v43 }
  0x1d   :  { %114 = vmatpush1.msra.mxu0 %v28_v39  ;;  %382 = vmatpush3.msra.mxu1 %v33_v43 }
  0x1e   :  { %115 = vmatprep.subr.mxu0 %v26_v41  ;;  %383 = vmatprep.subr.mxu1 %v30_v46 }
  0x1f   :  { %116 = vmatpush1.msra.mxu0 %v25_v42  ;;  %384 = vmatpush3.msra.mxu1 %v30_v46 }
  0x20   :  { %117 = vmatprep.subr.mxu0 %v23_v44  ;;  %385 = vmatprep.subr.mxu1 %v27_v48 }
  0x21   :  { %118 = vmatpush1.msra.mxu0 %v22_v45  ;;  %386 = vmatpush3.msra.mxu1 %v27_v48 }
  0x22   :  { %152 = vmatmul.mubr.f32.vlgmr.msra.gmra.mxu0 %v14_v47  ;;  %389 = vmatprep.mubr.f32.mxu1 %v14_v47 }
  0x23   :  { %157 = vmatprep.mubr.f32.mxu0 %v402_v3  ;;  %387 = vmatprep.subr.mxu1 %v24_v49 }
  0x24   :  { %388 = vmatpush3.msra.mxu1 %v24_v49 }
  0x25   :  { %390 = vmatmul.mubr.f32.vlgmr.msra.gmra.mxu1 %v15_v50 }
  0x26   :  { %158 = vmatmul.mubr.f32.gmra.mxu0 %v15_v50  ;;  %392 = vmatprep.mubr.f32.mxu1 %v16_v51 }
  0x27   :  { %163 = vmatprep.mubr.f32.mxu0 %v402_v3 }
  0x29   :  { %393 = vmatmul.mubr.f32.gmra.mxu1 %v17_v52 }
  0x2a   :  { %164 = vmatmul.mubr.f32.gmra.mxu0 %v16_v51  ;;  %395 = vmatprep.mubr.f32.mxu1 %v18_v53 }
  0x2b   :  { %169 = vmatprep.mubr.f32.mxu0 %v402_v3 }
  0x2d   :  { %396 = vmatmul.mubr.f32.gmra.mxu1 %v19_v55 }
  0x2e   :  { %170 = vmatmul.mubr.f32.gmra.mxu0 %v17_v52  ;;  %398 = vmatprep.mubr.f32.mxu1 %v20_v54 }
  0x2f   :  { %175 = vmatprep.mubr.f32.mxu0 %v402_v3 }
  0x31   :  { %399 = vmatmul.mubr.f32.gmra.mxu1 %v21_v56 }
  0x32   :  { %176 = vmatmul.mubr.f32.gmra.mxu0 %v18_v53 }
  0x33   :  { %181 = vmatprep.mubr.f32.mxu0 %v402_v3 }
  0x36   :  { %182 = vmatmul.mubr.f32.gmra.mxu0 %v19_v55 }
  0x37   :  { %187 = vmatprep.mubr.f32.mxu0 %v402_v3 }
  0x3a   :  { %188 = vmatmul.mubr.f32.gmra.mxu0 %v20_v54 }
  0x3b   :  { %193 = vmatprep.mubr.f32.mxu0 %v402_v3 }
  0x3e   :  { %194 = vmatmul.mubr.f32.gmra.mxu0 %v21_v56 }
  0xe2   :  { %v153_v1 = vpop.f32.mrf.mxu0 }
  0xe3   :  { %v154_v2 = vadd.f32 %v153_v1, %v602_v62 }
  0xe4   :  { %v155_v4 = vpop.f32.mrf.mxu0 }
  0xe5   :  { %305 = vst [vmem:[%s697_s3] sm:$0xff] %v154_v2  ;;  %v156_v3 = vadd.f32 %v155_v4, %v604_v0  ;;  %v391_v8 = vpop.f32.mrf.mxu1 }
  0xe6   :  { %v159_v6 = vpop.f32.mrf.mxu0  ;;  %v272_v10 = vadd.f32 %v391_v8, %v83_v5 }
  0xe7   :  { %306 = vst [vmem:[%s697_s3 + $0x8] sm:$0xff] %v156_v3  ;;  %v160_v7 = vadd.f32 %v159_v6, %v602_v62  ;;  %v266_v12 = vpop.f32.mrf.mxu1 }
  0xe8   :  { %v161_v9 = vpop.f32.mrf.mxu0  ;;  %310 = vst [vmem:[%s697_s3 + $0x28] sm:$0xff] %v272_v10  ;;  %v267_v14 = vadd.f32 %v266_v12, %v83_v5 }
  0xe9   :  { %308 = vst [vmem:[%s697_s3 + $0x18] sm:$0xff] %v160_v7  ;;  %v162_v11 = vadd.f32 %v161_v9, %v604_v0  ;;  %v394_v16 = vpop.f32.mrf.mxu1 }
  0xea   :  { %v165_v13 = vpop.f32.mrf.mxu0  ;;  %307 = vst [vmem:[%s697_s3 + $0x10] sm:$0xff] %v267_v14  ;;  %v282_v18 = vadd.f32 %v394_v16, %v83_v5 }
  0xeb   :  { %309 = vst [vmem:[%s697_s3 + $0x20] sm:$0xff] %v162_v11  ;;  %v166_v15 = vadd.f32 %v165_v13, %v602_v62  ;;  %v276_v20 = vpop.f32.mrf.mxu1 }
  0xec   :  { %v167_v17 = vpop.f32.mrf.mxu0  ;;  %316 = vst [vmem:[%s697_s3 + $0x58] sm:$0xff] %v282_v18  ;;  %v277_v22 = vadd.f32 %v276_v20, %v83_v5 }
  0xed   :  { %311 = vst [vmem:[%s697_s3 + $0x30] sm:$0xff] %v166_v15  ;;  %v168_v19 = vadd.f32 %v167_v17, %v604_v0  ;;  %v397_v24 = vpop.f32.mrf.mxu1 }
  0xee   :  { %v171_v21 = vpop.f32.mrf.mxu0  ;;  %313 = vst [vmem:[%s697_s3 + $0x40] sm:$0xff] %v277_v22  ;;  %v292_v26 = vadd.f32 %v397_v24, %v83_v5 }
  0xef   :  { %312 = vst [vmem:[%s697_s3 + $0x38] sm:$0xff] %v168_v19  ;;  %v172_v23 = vadd.f32 %v171_v21, %v602_v62  ;;  %v286_v28 = vpop.f32.mrf.mxu1 }
  0xf0   :  { %v173_v25 = vpop.f32.mrf.mxu0  ;;  %322 = vst [vmem:[%s697_s3 + $0x88] sm:$0xff] %v292_v26  ;;  %v287_v30 = vadd.f32 %v286_v28, %v83_v5 }
  0xf1   :  { %314 = vst [vmem:[%s697_s3 + $0x48] sm:$0xff] %v172_v23  ;;  %v174_v27 = vadd.f32 %v173_v25, %v604_v0  ;;  %v400_v32 = vpop.f32.mrf.mxu1 }
  0xf2   :  { %v177_v29 = vpop.f32.mrf.mxu0  ;;  %319 = vst [vmem:[%s697_s3 + $0x70] sm:$0xff] %v287_v30  ;;  %v302_v34 = vadd.f32 %v400_v32, %v83_v5 }
  0xf3   :  { %315 = vst [vmem:[%s697_s3 + $0x50] sm:$0xff] %v174_v27  ;;  %v178_v31 = vadd.f32 %v177_v29, %v602_v62  ;;  %v296_v36 = vpop.f32.mrf.mxu1 }
  0xf4   :  { %v179_v33 = vpop.f32.mrf.mxu0  ;;  %328 = vst [vmem:[%s697_s3 + $0xb8] sm:$0xff] %v302_v34  ;;  %v297_v38 = vadd.f32 %v296_v36, %v83_v5 }
  0xf5   :  { %317 = vst [vmem:[%s697_s3 + $0x60] sm:$0xff] %v178_v31  ;;  %v180_v35 = vadd.f32 %v179_v33, %v604_v0 }
  0xf6   :  { %v183_v37 = vpop.f32.mrf.mxu0  ;;  %325 = vst [vmem:[%s697_s3 + $0xa0] sm:$0xff] %v297_v38 }
  0xf7   :  { %318 = vst [vmem:[%s697_s3 + $0x68] sm:$0xff] %v180_v35  ;;  %v184_v39 = vadd.f32 %v183_v37, %v602_v62 }
  0xf8   :  { %v185_v40 = vpop.f32.mrf.mxu0 }
  0xf9   :  { %320 = vst [vmem:[%s697_s3 + $0x78] sm:$0xff] %v184_v39  ;;  %v186_v41 = vadd.f32 %v185_v40, %v604_v0 }
  0xfa   :  { %v189_v42 = vpop.f32.mrf.mxu0 }
  0xfb   :  { %321 = vst [vmem:[%s697_s3 + $0x80] sm:$0xff] %v186_v41  ;;  %v190_v43 = vadd.f32 %v189_v42, %v602_v62 }
  0xfc   :  { %v191_v44 = vpop.f32.mrf.mxu0 }
  0xfd   :  { %323 = vst [vmem:[%s697_s3 + $0x90] sm:$0xff] %v190_v43  ;;  %v192_v45 = vadd.f32 %v191_v44, %v604_v0 }
  0xfe   :  { %v195_v46 = vpop.f32.mrf.mxu0 }
  0xff   :  { %324 = vst [vmem:[%s697_s3 + $0x98] sm:$0xff] %v192_v45  ;;  %v196_v47 = vadd.f32 %v195_v46, %v602_v62 }
 0x100   :  { %v197_v48 = vpop.f32.mrf.mxu0 }
 0x101   :  { %326 = vst [vmem:[%s697_s3 + $0xa8] sm:$0xff] %v196_v47  ;;  %v198_v49 = vadd.f32 %v197_v48, %v604_v0 }
 0x103   :  { %327 = vst [vmem:[%s697_s3 + $0xb0] sm:$0xff] %v198_v49 }

// kernel: decoder_rnn_forward.4
= control target key start
LH: loop header
LB: loop body
LE: loop exit
PB: predicated region body
PF: predicated region fallthrough
CT: control target
= control target key end

     0   :  { %v3236_v3 = vmov 0.0   ;;  %vm2047_vm0 = vmmov 0   ;;  %s3232_s1 = inlined_call_operand.vmem [shape: f32[128,384], index: 1, kind: input, shape index: {}]   ;;  %s3233_s0 = inlined_call_operand.vmem [shape: f32[64,384], index: 0, kind: input, shape index: {}]   ;;  %s3234_s2 = inlined_call_operand.vmem [shape: f32[1,128], index: 2, kind: input, shape index: {}]   ;;  %s3235_s3 = inlined_call_operand.vmem [shape: f32[64,128], index: 3, kind: output, shape index: {}]  }
   0x1   :  { %v2071_v0 = vld [vmem:[%s3232_s1 + $0x170] sm:$0xff]  ;;  %v2076_v1 = vld [vmem:[%s3232_s1 + $0x168] sm:$0xff]  ;;  %v2081_v2 = vld [vmem:[%s3232_s1 + $0x158] sm:$0xff]  ;;  %1635 = vmatprep.subr.mxu1 %v3236_v3  ;;  %145 = vmatprep.mubr.f32.mxu0 %v3236_v3 }
   0x2   :  { %3246 = vst [vmem:[#allocation3_spill] sm:$0xff] %v2071_v0  ;;  %81 = vmatprep.subr.mxu0 %v2071_v0  ;;  %v2089_v4 = vld [vmem:[%s3232_s1 + $0x150] sm:$0xff]  ;;  %1667 = vmatprep.mubr.msk.f32.mxu1 %vm2047_vm0, %v3236_v3  ;;  %v2097_v5 = vld [vmem:[%s3232_s1 + $0x140] sm:$0xff]  ;;  %v2103_v6 = vld [vmem:[%s3232_s1 + $0x138] sm:$0xff] }
   0x3   :  { %82 = vmatpush1.msra.mxu0 %v2076_v1  ;;  %v2109_v7 = vld [vmem:[%s3232_s1 + $0x128] sm:$0xff]  ;;  %v2115_v8 = vld [vmem:[%s3232_s1 + $0x120] sm:$0xff]  ;;  %v2121_v9 = vld [vmem:[%s3232_s1 + $0x110] sm:$0xff] }
   0x4   :  { %83 = vmatprep.subr.mxu0 %v2081_v2  ;;  %v2127_v10 = vld [vmem:[%s3232_s1 + $0x108] sm:$0xff]  ;;  %v2133_v11 = vld [vmem:[%s3232_s1 + $0xf8] sm:$0xff]  ;;  %v2139_v12 = vld [vmem:[%s3232_s1 + $0xf0] sm:$0xff] }
   0x5   :  { %84 = vmatpush1.msra.mxu0 %v2089_v4  ;;  %v2145_v13 = vld [vmem:[%s3232_s1 + $0xe0] sm:$0xff]  ;;  %v2150_v14 = vld [vmem:[%s3232_s1 + $0x178] sm:$0xff]  ;;  %v2168_v17 = vld [vmem:[%s3232_s1 + $0xc8] sm:$0xff] }
   0x6   :  { %85 = vmatprep.subr.mxu0 %v2097_v5  ;;  %v2156_v15 = vld [vmem:[%s3232_s1 + $0xd8] sm:$0xff]  ;;  %1636 = vmatpush3.msra.mxu1 %v2150_v14  ;;  %v2162_v16 = vld [vmem:[%s3232_s1 + $0x160] sm:$0xff]  ;;  %v2174_v18 = vld [vmem:[%s3232_s1 + $0x148] sm:$0xff] }
   0x7   :  { %86 = vmatpush1.msra.mxu0 %v2103_v6  ;;  %1637 = vmatprep.subr.mxu1 %v3236_v3  ;;  %v2180_v19 = vld [vmem:[%s3232_s1 + $0xc0] sm:$0xff]  ;;  %v2187_v20 = vld [vmem:[%s3232_s1 + $0xb0] sm:$0xff]  ;;  %v2199_v22 = vld [vmem:[%s3232_s1 + $0xa8] sm:$0xff] }
   0x8   :  { %87 = vmatprep.subr.mxu0 %v2109_v7  ;;  %1638 = vmatpush3.msra.mxu1 %v2162_v16  ;;  %v2193_v21 = vld [vmem:[%s3232_s1 + $0x130] sm:$0xff]  ;;  %v2206_v23 = vld [vmem:[%s3232_s1 + $0x98] sm:$0xff]  ;;  %v2225_v26 = vld [vmem:[%s3232_s1 + $0x80] sm:$0xff] }
   0x9   :  { %88 = vmatpush1.msra.mxu0 %v2115_v8  ;;  %1639 = vmatprep.subr.mxu1 %v3236_v3  ;;  %v2212_v24 = vld [vmem:[%s3232_s1 + $0x118] sm:$0xff]  ;;  %v2218_v25 = vld [vmem:[%s3232_s1 + $0x90] sm:$0xff]  ;;  %v2231_v27 = vld [vmem:[%s3232_s1 + $0x100] sm:$0xff] }
   0xa   :  { %89 = vmatprep.subr.mxu0 %v2121_v9  ;;  %1640 = vmatpush3.msra.mxu1 %v2174_v18  ;;  %v2237_v28 = vld [vmem:[%s3232_s1 + $0x78] sm:$0xff]  ;;  %v2244_v29 = vld [vmem:[%s3232_s1 + $0x68] sm:$0xff]  ;;  %v2256_v31 = vld [vmem:[%s3232_s1 + $0x60] sm:$0xff] }
   0xb   :  { %90 = vmatpush1.msra.mxu0 %v2127_v10  ;;  %1641 = vmatprep.subr.mxu1 %v3236_v3  ;;  %v2250_v30 = vld [vmem:[%s3232_s1 + $0xe8] sm:$0xff]  ;;  %v2263_v32 = vld [vmem:[%s3232_s1 + $0x50] sm:$0xff]  ;;  %v2282_v35 = vld [vmem:[%s3232_s1 + $0x38] sm:$0xff] }
   0xc   :  { %91 = vmatprep.subr.mxu0 %v2133_v11  ;;  %1642 = vmatpush3.msra.mxu1 %v2193_v21  ;;  %v2269_v33 = vld [vmem:[%s3232_s1 + $0xd0] sm:$0xff]  ;;  %v2275_v34 = vld [vmem:[%s3232_s1 + $0x48] sm:$0xff]  ;;  %v2288_v36 = vld [vmem:[%s3232_s1 + $0xb8] sm:$0xff] }
   0xd   :  { %92 = vmatpush1.msra.mxu0 %v2139_v12  ;;  %1643 = vmatprep.subr.mxu1 %v3236_v3  ;;  %v2294_v37 = vld [vmem:[%s3232_s1 + $0x30] sm:$0xff]  ;;  %v2301_v38 = vld [vmem:[%s3232_s1 + $0x20] sm:$0xff]  ;;  %v2313_v40 = vld [vmem:[%s3232_s1 + $0x18] sm:$0xff] }
   0xe   :  { %93 = vmatprep.subr.mxu0 %v2145_v13  ;;  %1644 = vmatpush3.msra.mxu1 %v2212_v24  ;;  %v2307_v39 = vld [vmem:[%s3232_s1 + $0xa0] sm:$0xff]  ;;  %v2320_v41 = vld [vmem:[%s3232_s1 + $0x8] sm:$0xff]  ;;  %v2340_v44 = vld [vmem:[%s3232_s1 + $0x70] sm:$0xff] }
   0xf   :  { %94 = vmatpush1.msra.mxu0 %v2156_v15  ;;  %1645 = vmatprep.subr.mxu1 %v3236_v3  ;;  %v2326_v42 = vld [vmem:[%s3232_s1 + $0x88] sm:$0xff]  ;;  %v2332_v43 = vld [vmem:[%s3232_s1] sm:$0xff]  ;;  %v2349_v45 = vld [vmem:[%s3232_s1 + $0x58] sm:$0xff] }
  0x10   :  { %95 = vmatprep.subr.mxu0 %v2168_v17  ;;  %1646 = vmatpush3.msra.mxu1 %v2231_v27  ;;  %3247 = vst [vmem:[#allocation4_spill] sm:$0xff] %v2332_v43  ;;  %v2357_v46 = vld [vmem:[%s3232_s1 + $0x40] sm:$0xff]  ;;  %v2366_v47 = vld [vmem:[%s3232_s1 + $0x28] sm:$0xff]  ;;  %v2375_v48 = vld [vmem:[%s3232_s1 + $0x10] sm:$0xff] }
  0x11   :  { %96 = vmatpush1.msra.mxu0 %v2180_v19  ;;  %1647 = vmatprep.subr.mxu1 %v3236_v3  ;;  %3248 = vst [vmem:[#allocation5_spill] sm:$0xff] %v2375_v48  ;;  %v78_v49 = vld [vmem:[%s3233_s0] sm:$0xff]  ;;  %v79_v53 = vld [vmem:[%s3233_s0 + $0x8] sm:$0xff] }
  0x12   :  { %97 = vmatprep.subr.mxu0 %v2187_v20  ;;  %1648 = vmatpush3.msra.mxu1 %v2250_v30  ;;  %v2455_v62 = vld [vmem:[%s3234_s2] ss:$0 sm:$0xff] }
  0x13   :  { %98 = vmatpush1.msra.mxu0 %v2199_v22  ;;  %1649 = vmatprep.subr.mxu1 %v3236_v3 }
  0x14   :  { %99 = vmatprep.subr.mxu0 %v2206_v23  ;;  %1650 = vmatpush3.msra.mxu1 %v2269_v33 }
  0x15   :  { %100 = vmatpush1.msra.mxu0 %v2218_v25  ;;  %1651 = vmatprep.subr.mxu1 %v3236_v3 }
  0x16   :  { %101 = vmatprep.subr.mxu0 %v2225_v26  ;;  %1652 = vmatpush3.msra.mxu1 %v2288_v36 }
  0x17   :  { %102 = vmatpush1.msra.mxu0 %v2237_v28  ;;  %1653 = vmatprep.subr.mxu1 %v3236_v3 }
  0x18   :  { %103 = vmatprep.subr.mxu0 %v2244_v29  ;;  %1654 = vmatpush3.msra.mxu1 %v2307_v39 }
  0x19   :  { %104 = vmatpush1.msra.mxu0 %v2256_v31  ;;  %1655 = vmatprep.subr.mxu1 %v3236_v3 }
  0x1a   :  { %105 = vmatprep.subr.mxu0 %v2263_v32  ;;  %1656 = vmatpush3.msra.mxu1 %v2326_v42 }
  0x1b   :  { %106 = vmatpush1.msra.mxu0 %v2275_v34  ;;  %1657 = vmatprep.subr.mxu1 %v3236_v3 }
  0x1c   :  { %107 = vmatprep.subr.mxu0 %v2282_v35  ;;  %1658 = vmatpush3.msra.mxu1 %v2340_v44 }
  0x1d   :  { %108 = vmatpush1.msra.mxu0 %v2294_v37  ;;  %1659 = vmatprep.subr.mxu1 %v3236_v3 }
  0x1e   :  { %109 = vmatprep.subr.mxu0 %v2301_v38  ;;  %1660 = vmatpush3.msra.mxu1 %v2349_v45 }
  0x1f   :  { %110 = vmatpush1.msra.mxu0 %v2313_v40  ;;  %1661 = vmatprep.subr.mxu1 %v3236_v3 }
  0x20   :  { %111 = vmatprep.subr.mxu0 %v2320_v41  ;;  %1662 = vmatpush3.msra.mxu1 %v2357_v46 }
  0x21   :  { %112 = vmatpush1.msra.mxu0 %v2332_v43  ;;  %1663 = vmatprep.subr.mxu1 %v3236_v3 }
  0x22   :  { %146 = vmatmul.mubr.f32.vlgmr.msra.gmra.mxu0 %v3236_v3  ;;  %251 = vmatprep.subr.mxu0 %v2071_v0 }
  0x23   :  { %252 = vmatpush1.msra.mxu0 %v2076_v1  ;;  %1664 = vmatpush3.msra.mxu1 %v2366_v47 }
  0x24   :  { %253 = vmatprep.subr.mxu0 %v2081_v2  ;;  %1665 = vmatprep.subr.mxu1 %v3236_v3 }
  0x25   :  { %254 = vmatpush1.msra.mxu0 %v2089_v4  ;;  %1666 = vmatpush3.msra.mxu1 %v2375_v48 }
  0x26   :  { %255 = vmatprep.subr.mxu0 %v2097_v5  ;;  %1668 = vmatmul.mubr.f32.vlgmr.msra.gmra.mxu1 %v3236_v3 }
  0x27   :  { %256 = vmatpush1.msra.mxu0 %v2103_v6  ;;  %1670 = vmatprep.subr.mxu1 %v3236_v3 }
  0x28   :  { %257 = vmatprep.subr.mxu0 %v2109_v7  ;;  %1671 = vmatpush3.msra.mxu1 %v2150_v14 }
  0x29   :  { %258 = vmatpush1.msra.mxu0 %v2115_v8  ;;  %1672 = vmatprep.subr.mxu1 %v3236_v3 }
  0x2a   :  { %259 = vmatprep.subr.mxu0 %v2121_v9  ;;  %1673 = vmatpush3.msra.mxu1 %v2162_v16 }
  0x2b   :  { %260 = vmatpush1.msra.mxu0 %v2127_v10  ;;  %1674 = vmatprep.subr.mxu1 %v3236_v3 }
  0x2c   :  { %261 = vmatprep.subr.mxu0 %v2133_v11  ;;  %1675 = vmatpush3.msra.mxu1 %v2174_v18 }
  0x2d   :  { %262 = vmatpush1.msra.mxu0 %v2139_v12  ;;  %1676 = vmatprep.subr.mxu1 %v3236_v3 }
  0x2e   :  { %263 = vmatprep.subr.mxu0 %v2145_v13  ;;  %1677 = vmatpush3.msra.mxu1 %v2193_v21 }
  0x2f   :  { %264 = vmatpush1.msra.mxu0 %v2156_v15  ;;  %1678 = vmatprep.subr.mxu1 %v3236_v3 }
  0x30   :  { %265 = vmatprep.subr.mxu0 %v2168_v17  ;;  %1679 = vmatpush3.msra.mxu1 %v2212_v24 }
  0x31   :  { %266 = vmatpush1.msra.mxu0 %v2180_v19  ;;  %1680 = vmatprep.subr.mxu1 %v3236_v3 }
  0x32   :  { %267 = vmatprep.subr.mxu0 %v2187_v20  ;;  %1681 = vmatpush3.msra.mxu1 %v2231_v27 }
  0x33   :  { %268 = vmatpush1.msra.mxu0 %v2199_v22  ;;  %1682 = vmatprep.subr.mxu1 %v3236_v3 }
  0x34   :  { %269 = vmatprep.subr.mxu0 %v2206_v23  ;;  %1683 = vmatpush3.msra.mxu1 %v2250_v30 }
  0x35   :  { %270 = vmatpush1.msra.mxu0 %v2218_v25  ;;  %1684 = vmatprep.subr.mxu1 %v3236_v3 }
  0x36   :  { %271 = vmatprep.subr.mxu0 %v2225_v26  ;;  %1685 = vmatpush3.msra.mxu1 %v2269_v33 }
  0x37   :  { %272 = vmatpush1.msra.mxu0 %v2237_v28  ;;  %1686 = vmatprep.subr.mxu1 %v3236_v3 }
  0x38   :  { %273 = vmatprep.subr.mxu0 %v2244_v29  ;;  %1687 = vmatpush3.msra.mxu1 %v2288_v36 }
  0x39   :  { %274 = vmatpush1.msra.mxu0 %v2256_v31  ;;  %1688 = vmatprep.subr.mxu1 %v3236_v3 }
  0x3a   :  { %275 = vmatprep.subr.mxu0 %v2263_v32  ;;  %1689 = vmatpush3.msra.mxu1 %v2307_v39 }
  0x3b   :  { %276 = vmatpush1.msra.mxu0 %v2275_v34  ;;  %1690 = vmatprep.subr.mxu1 %v3236_v3 }
  0x3c   :  { %277 = vmatprep.subr.mxu0 %v2282_v35  ;;  %1691 = vmatpush3.msra.mxu1 %v2326_v42 }
  0x3d   :  { %278 = vmatpush1.msra.mxu0 %v2294_v37  ;;  %1692 = vmatprep.subr.mxu1 %v3236_v3 }
  0x3e   :  { %279 = vmatprep.subr.mxu0 %v2301_v38  ;;  %1693 = vmatpush3.msra.mxu1 %v2340_v44 }
  0x3f   :  { %280 = vmatpush1.msra.mxu0 %v2313_v40  ;;  %1694 = vmatprep.subr.mxu1 %v3236_v3 }
  0x40   :  { %281 = vmatprep.subr.mxu0 %v2320_v41  ;;  %1695 = vmatpush3.msra.mxu1 %v2349_v45 }
  0x41   :  { %282 = vmatpush1.msra.mxu0 %v2332_v43  ;;  %315 = vmatprep.mubr.f32.mxu0 %v3236_v3 }
  0x42   :  { %1696 = vmatprep.subr.mxu1 %v3236_v3  ;;  %1702 = vmatprep.mubr.msk.f32.mxu1 %vm2047_vm0, %v3236_v3 }
  0x43   :  { %1697 = vmatpush3.msra.mxu1 %v2357_v46  ;;  %422 = vmatprep.subr.mxu0 %v2071_v0 }
  0x44   :  { %1698 = vmatprep.subr.mxu1 %v3236_v3 }
  0x45   :  { %1699 = vmatpush3.msra.mxu1 %v2366_v47 }
  0x46   :  { %1700 = vmatprep.subr.mxu1 %v3236_v3 }
  0x47   :  { %1701 = vmatpush3.msra.mxu1 %v2375_v48 }
  0x48   :  { %1705 = vmatprep.subr.mxu1 %v3236_v3 }
  0xe2   :  { %v147_v50 = vpop.f32.mrf.mxu0 }
  0xe3   :  { %v222_v51 = vadd.f32 %v147_v50, %v78_v49 }
  0xe4   :  { %v149_v54 = vpop.f32.mrf.mxu0 }
  0xe5   :  { %v1455_v52 = vmul.f32 -1.442695, %v222_v51  ;;  %v229_v55 = vadd.f32 %v149_v54, %v79_v53  ;;  %v80_v51 = vld [vmem:[%s3233_s0 + $0x10] sm:$0xff] }
  0xe6   :  { %v218_v56 = vpop.f32.mrf.mxu1 }
  0xe7   :  { %1917 = vpow2.f32 %v1455_v52  ;;  %v1456_v57 = vmul.f32 -1.442695, %v229_v55  ;;  %v236_v49 = vadd.f32 %v2455_v62, %v218_v56  ;;  %v1457_v56 = vld [vmem:[%s3233_s0 + $0x18] sm:$0xff] }
  0xe8   :  { %v1669_v58 = vpop.f32.mrf.mxu1 }
  0xe9   :  { %1919 = vpow2.f32 %v1456_v57 }
  0xf4   :  { %v1918_v59 = vpop.eup %1917 }
  0xf5   :  { %v226_v60 = vadd.f32 1.0, %v1918_v59 }
  0xf6   :  { %v1920_v61 = vpop.eup %1919 }
  0xf7   :  { %1921 = vrcp.f32 %v226_v60  ;;  %v233_v63 = vadd.f32 1.0, %v1920_v61 }
  0xf9   :  { %1923 = vrcp.f32 %v233_v63 }
 0x104   :  { %v1922_v50 = vpop.eup %1921 }
 0x105   :  { %v237_v52 = vmul.f32 %v1922_v50, %v236_v49 }
 0x106   :  { %v1924_v54 = vpop.eup %1923 }
 0x107   :  { %v238_v53 = vadd.f32 %v237_v52, %v80_v51  ;;  %v240_v55 = vsub.f32 1.0, %v1924_v54  ;;  %v242_v59 = vmul.f32 0.0, %v1924_v54  ;;  %v1458_v52 = vld [vmem:[%s3233_s0 + $0x20] sm:$0xff] }
 0x109   :  { %1925 = vtanh.f32 %v238_v53 }
 0x116   :  { %v1926_v57 = vpop.eup %1925 }
 0x117   :  { %v241_v58 = vmul.f32 %v1926_v57, %v240_v55 }
 0x119   :  { %v2461_v60 = vadd.f32 %v242_v59, %v241_v58 }
 0x11b   :  { %244 = vst [vmem:[%s3235_s3] sm:$0xff] %v2461_v60  ;;  %316 = vmatmul.mubr.f32.vlgmr.msra.gmra.mxu0 %v2461_v60  ;;  %1703 = vmatmul.mubr.f32.vlgmr.msra.gmra.mxu1 %v2461_v60 }
 0x11c   :  { %423 = vmatpush1.msra.mxu0 %v2076_v1  ;;  %1706 = vmatpush3.msra.mxu1 %v2150_v14 }
 0x11d   :  { %424 = vmatprep.subr.mxu0 %v2081_v2  ;;  %1707 = vmatprep.subr.mxu1 %v3236_v3 }
 0x11e   :  { %425 = vmatpush1.msra.mxu0 %v2089_v4  ;;  %1708 = vmatpush3.msra.mxu1 %v2162_v16 }
 0x11f   :  { %426 = vmatprep.subr.mxu0 %v2097_v5  ;;  %1709 = vmatprep.subr.mxu1 %v3236_v3 }
 0x120   :  { %427 = vmatpush1.msra.mxu0 %v2103_v6  ;;  %1710 = vmatpush3.msra.mxu1 %v2174_v18 }
 0x121   :  { %428 = vmatprep.subr.mxu0 %v2109_v7  ;;  %1711 = vmatprep.subr.mxu1 %v3236_v3 }
 0x122   :  { %429 = vmatpush1.msra.mxu0 %v2115_v8  ;;  %1712 = vmatpush3.msra.mxu1 %v2193_v21 }
 0x123   :  { %430 = vmatprep.subr.mxu0 %v2121_v9  ;;  %1713 = vmatprep.subr.mxu1 %v3236_v3 }
 0x124   :  { %431 = vmatpush1.msra.mxu0 %v2127_v10  ;;  %1714 = vmatpush3.msra.mxu1 %v2212_v24 }
 0x125   :  { %432 = vmatprep.subr.mxu0 %v2133_v11  ;;  %1715 = vmatprep.subr.mxu1 %v3236_v3 }
 0x126   :  { %433 = vmatpush1.msra.mxu0 %v2139_v12  ;;  %1716 = vmatpush3.msra.mxu1 %v2231_v27 }
 0x127   :  { %434 = vmatprep.subr.mxu0 %v2145_v13  ;;  %1717 = vmatprep.subr.mxu1 %v3236_v3 }
 0x128   :  { %435 = vmatpush1.msra.mxu0 %v2156_v15  ;;  %1718 = vmatpush3.msra.mxu1 %v2250_v30 }
 0x129   :  { %436 = vmatprep.subr.mxu0 %v2168_v17  ;;  %1719 = vmatprep.subr.mxu1 %v3236_v3 }
 0x12a   :  { %437 = vmatpush1.msra.mxu0 %v2180_v19  ;;  %1720 = vmatpush3.msra.mxu1 %v2269_v33 }
 0x12b   :  { %438 = vmatprep.subr.mxu0 %v2187_v20  ;;  %1721 = vmatprep.subr.mxu1 %v3236_v3 }
 0x12c   :  { %439 = vmatpush1.msra.mxu0 %v2199_v22  ;;  %1722 = vmatpush3.msra.mxu1 %v2288_v36 }
 0x12d   :  { %440 = vmatprep.subr.mxu0 %v2206_v23  ;;  %1723 = vmatprep.subr.mxu1 %v3236_v3 }
 0x12e   :  { %441 = vmatpush1.msra.mxu0 %v2218_v25  ;;  %1724 = vmatpush3.msra.mxu1 %v2307_v39 }
 0x12f   :  { %442 = vmatprep.subr.mxu0 %v2225_v26  ;;  %1725 = vmatprep.subr.mxu1 %v3236_v3 }
 0x130   :  { %443 = vmatpush1.msra.mxu0 %v2237_v28  ;;  %1726 = vmatpush3.msra.mxu1 %v2326_v42 }
 0x131   :  { %444 = vmatprep.subr.mxu0 %v2244_v29  ;;  %1727 = vmatprep.subr.mxu1 %v3236_v3 }
 0x132   :  { %445 = vmatpush1.msra.mxu0 %v2256_v31  ;;  %1728 = vmatpush3.msra.mxu1 %v2340_v44 }
 0x133   :  { %446 = vmatprep.subr.mxu0 %v2263_v32  ;;  %1729 = vmatprep.subr.mxu1 %v3236_v3 }
 0x134   :  { %447 = vmatpush1.msra.mxu0 %v2275_v34  ;;  %1730 = vmatpush3.msra.mxu1 %v2349_v45 }
 0x135   :  { %448 = vmatprep.subr.mxu0 %v2282_v35  ;;  %1731 = vmatprep.subr.mxu1 %v3236_v3 }
 0x136   :  { %449 = vmatpush1.msra.mxu0 %v2294_v37  ;;  %1732 = vmatpush3.msra.mxu1 %v2357_v46 }
 0x137   :  { %450 = vmatprep.subr.mxu0 %v2301_v38  ;;  %1733 = vmatprep.subr.mxu1 %v3236_v3 }
 0x138   :  { %451 = vmatpush1.msra.mxu0 %v2313_v40  ;;  %1734 = vmatpush3.msra.mxu1 %v2366_v47 }
 0x139   :  { %452 = vmatprep.subr.mxu0 %v2320_v41  ;;  %1735 = vmatprep.subr.mxu1 %v3236_v3 }
 0x13a   :  { %453 = vmatpush1.msra.mxu0 %v2332_v43  ;;  %486 = vmatprep.mubr.f32.mxu0 %v3236_v3 }
 0x13b   :  { %1736 = vmatpush3.msra.mxu1 %v2375_v48  ;;  %1737 = vmatprep.mubr.msk.f32.mxu1 %vm2047_vm0, %v3236_v3 }
 0x13c   :  { %593 = vmatprep.subr.mxu0 %v2071_v0  ;;  %1740 = vmatprep.subr.mxu1 %v3236_v3 }
 0x1db   :  { %v317_v61 = vpop.f32.mrf.mxu0  ;;  %v388_v63 = vpop.f32.mrf.mxu1 }
 0x1dc   :  { %v392_v49 = vadd.f32 %v1457_v56, %v317_v61  ;;  %v406_v0 = vadd.f32 %v2455_v62, %v388_v63  ;;  %v1459_v56 = vld [vmem:[%s3233_s0 + $0x28] sm:$0xff] }
 0x1dd   :  { %v1704_v50 = vpop.f32.mrf.mxu1  ;;  %v319_v53 = vpop.f32.mrf.mxu0 }
 0x1de   :  { %v1460_v51 = vmul.f32 -1.442695, %v392_v49  ;;  %v399_v54 = vadd.f32 %v1458_v52, %v319_v53 }
 0x1e0   :  { %1927 = vpow2.f32 %v1460_v51  ;;  %v1461_v55 = vmul.f32 -1.442695, %v399_v54 }
 0x1e2   :  { %1929 = vpow2.f32 %v1461_v55 }
 0x1ed   :  { %v1928_v57 = vpop.eup %1927 }
 0x1ee   :  { %v396_v58 = vadd.f32 1.0, %v1928_v57 }
 0x1ef   :  { %v1930_v59 = vpop.eup %1929 }
 0x1f0   :  { %1931 = vrcp.f32 %v396_v58  ;;  %v403_v3 = vadd.f32 1.0, %v1930_v59 }
 0x1f2   :  { %1933 = vrcp.f32 %v403_v3  ;;  %v3250_v3 = vld [vmem:[#allocation5_spill] sm:$0xff] }
 0x1fd   :  { %v1932_v48 = vpop.eup %1931 }
 0x1fe   :  { %v407_v61 = vmul.f32 %v1932_v48, %v406_v0  ;;  %v3249_v0 = vmov 0.0   ;;  %v3251_v48 = vld [vmem:[#allocation3_spill] sm:$0xff] }
 0x1ff   :  { %v1934_v50 = vpop.eup %1933 }
 0x200   :  { %v408_v49 = vadd.f32 %v1459_v56, %v407_v61  ;;  %v410_v51 = vsub.f32 1.0, %v1934_v50  ;;  %v412_v54 = vmul.f32 %v1934_v50, %v2461_v60  ;;  %v1463_v60 = vld [vmem:[%s3233_s0 + $0x30] sm:$0xff]  ;;  %v1464_v61 = vld [vmem:[%s3233_s0 + $0x38] sm:$0xff] }
 0x202   :  { %1935 = vtanh.f32 %v408_v49 }
 0x20f   :  { %v1936_v52 = vpop.eup %1935 }
 0x210   :  { %v411_v53 = vmul.f32 %v1936_v52, %v410_v51 }
 0x212   :  { %v2547_v55 = vadd.f32 %v412_v54, %v411_v53 }
 0x214   :  { %1462 = vst [vmem:[%s3235_s3 + $0x8] sm:$0xff] %v2547_v55  ;;  %487 = vmatmul.mubr.f32.vlgmr.msra.gmra.mxu0 %v2547_v55  ;;  %1738 = vmatmul.mubr.f32.vlgmr.msra.gmra.mxu1 %v2547_v55 }
 0x215   :  { %594 = vmatpush1.msra.mxu0 %v2076_v1  ;;  %1741 = vmatpush3.msra.mxu1 %v2150_v14 }
 0x216   :  { %595 = vmatprep.subr.mxu0 %v2081_v2  ;;  %1742 = vmatprep.subr.mxu1 %v3249_v0 }
 0x217   :  { %596 = vmatpush1.msra.mxu0 %v2089_v4  ;;  %1743 = vmatpush3.msra.mxu1 %v2162_v16 }
 0x218   :  { %597 = vmatprep.subr.mxu0 %v2097_v5  ;;  %1744 = vmatprep.subr.mxu1 %v3249_v0 }
 0x219   :  { %598 = vmatpush1.msra.mxu0 %v2103_v6  ;;  %1745 = vmatpush3.msra.mxu1 %v2174_v18 }
 0x21a   :  { %599 = vmatprep.subr.mxu0 %v2109_v7  ;;  %1746 = vmatprep.subr.mxu1 %v3249_v0 }
 0x21b   :  { %600 = vmatpush1.msra.mxu0 %v2115_v8  ;;  %1747 = vmatpush3.msra.mxu1 %v2193_v21 }
 0x21c   :  { %601 = vmatprep.subr.mxu0 %v2121_v9  ;;  %1748 = vmatprep.subr.mxu1 %v3249_v0 }
 0x21d   :  { %602 = vmatpush1.msra.mxu0 %v2127_v10  ;;  %1749 = vmatpush3.msra.mxu1 %v2212_v24 }
 0x21e   :  { %603 = vmatprep.subr.mxu0 %v2133_v11  ;;  %1750 = vmatprep.subr.mxu1 %v3249_v0 }
 0x21f   :  { %604 = vmatpush1.msra.mxu0 %v2139_v12  ;;  %1751 = vmatpush3.msra.mxu1 %v2231_v27 }
 0x220   :  { %605 = vmatprep.subr.mxu0 %v2145_v13  ;;  %1752 = vmatprep.subr.mxu1 %v3249_v0 }
 0x221   :  { %606 = vmatpush1.msra.mxu0 %v2156_v15  ;;  %1753 = vmatpush3.msra.mxu1 %v2250_v30 }
 0x222   :  { %607 = vmatprep.subr.mxu0 %v2168_v17  ;;  %1754 = vmatprep.subr.mxu1 %v3249_v0 }
 0x223   :  { %608 = vmatpush1.msra.mxu0 %v2180_v19  ;;  %1755 = vmatpush3.msra.mxu1 %v2269_v33 }
 0x224   :  { %609 = vmatprep.subr.mxu0 %v2187_v20  ;;  %1756 = vmatprep.subr.mxu1 %v3249_v0 }
 0x225   :  { %610 = vmatpush1.msra.mxu0 %v2199_v22  ;;  %1757 = vmatpush3.msra.mxu1 %v2288_v36 }
 0x226   :  { %611 = vmatprep.subr.mxu0 %v2206_v23  ;;  %1758 = vmatprep.subr.mxu1 %v3249_v0 }
 0x227   :  { %612 = vmatpush1.msra.mxu0 %v2218_v25  ;;  %1759 = vmatpush3.msra.mxu1 %v2307_v39 }
 0x228   :  { %613 = vmatprep.subr.mxu0 %v2225_v26  ;;  %1760 = vmatprep.subr.mxu1 %v3249_v0 }
 0x229   :  { %614 = vmatpush1.msra.mxu0 %v2237_v28  ;;  %1761 = vmatpush3.msra.mxu1 %v2326_v42 }
 0x22a   :  { %615 = vmatprep.subr.mxu0 %v2244_v29  ;;  %1762 = vmatprep.subr.mxu1 %v3249_v0 }
 0x22b   :  { %616 = vmatpush1.msra.mxu0 %v2256_v31  ;;  %1763 = vmatpush3.msra.mxu1 %v2340_v44 }
 0x22c   :  { %617 = vmatprep.subr.mxu0 %v2263_v32  ;;  %1764 = vmatprep.subr.mxu1 %v3249_v0 }
 0x22d   :  { %618 = vmatpush1.msra.mxu0 %v2275_v34  ;;  %1765 = vmatpush3.msra.mxu1 %v2349_v45 }
 0x22e   :  { %619 = vmatprep.subr.mxu0 %v2282_v35  ;;  %1766 = vmatprep.subr.mxu1 %v3249_v0 }
 0x22f   :  { %620 = vmatpush1.msra.mxu0 %v2294_v37  ;;  %1767 = vmatpush3.msra.mxu1 %v2357_v46 }
 0x230   :  { %621 = vmatprep.subr.mxu0 %v2301_v38  ;;  %1768 = vmatprep.subr.mxu1 %v3249_v0 }
 0x231   :  { %622 = vmatpush1.msra.mxu0 %v2313_v40  ;;  %1769 = vmatpush3.msra.mxu1 %v2366_v47 }
 0x232   :  { %623 = vmatprep.subr.mxu0 %v2320_v41  ;;  %1770 = vmatprep.subr.mxu1 %v3249_v0 }
 0x233   :  { %624 = vmatpush1.msra.mxu0 %v2332_v43  ;;  %657 = vmatprep.mubr.f32.mxu0 %v3249_v0 }
 0x234   :  { %1771 = vmatpush3.msra.mxu1 %v3250_v3  ;;  %1772 = vmatprep.mubr.msk.f32.mxu1 %vm2047_vm0, %v3249_v0 }
 0x235   :  { %764 = vmatprep.subr.mxu0 %v3251_v48  ;;  %1775 = vmatprep.subr.mxu1 %v3249_v0 }
 0x2d4   :  { %v488_v63 = vpop.f32.mrf.mxu0  ;;  %v559_v57 = vpop.f32.mrf.mxu1 }
 0x2d5   :  { %v563_v58 = vadd.f32 %v1463_v60, %v488_v63  ;;  %v577_v3 = vadd.f32 %v2455_v62, %v559_v57  ;;  %v1465_v60 = vld [vmem:[%s3233_s0 + $0x40] sm:$0xff] }
 0x2d6   :  { %v1739_v59 = vpop.f32.mrf.mxu1  ;;  %v490_v49 = vpop.f32.mrf.mxu0 }
 0x2d7   :  { %v1466_v56 = vmul.f32 -1.442695, %v563_v58  ;;  %v570_v50 = vadd.f32 %v1464_v61, %v490_v49 }
 0x2d9   :  { %1937 = vpow2.f32 %v1466_v56  ;;  %v1467_v51 = vmul.f32 -1.442695, %v570_v50 }
 0x2db   :  { %1939 = vpow2.f32 %v1467_v51 }
 0x2e6   :  { %v1938_v52 = vpop.eup %1937 }
 0x2e7   :  { %v567_v53 = vadd.f32 1.0, %v1938_v52  ;;  %v1471_v52 = vld [vmem:[%s3233_s0 + $0x58] sm:$0xff] }
 0x2e8   :  { %v1940_v54 = vpop.eup %1939 }
 0x2e9   :  { %1941 = vrcp.f32 %v567_v53  ;;  %v574_v48 = vadd.f32 1.0, %v1940_v54 }
 0x2eb   :  { %1943 = vrcp.f32 %v574_v48 }
 0x2f6   :  { %v1942_v43 = vpop.eup %1941 }
 0x2f7   :  { %v578_v63 = vmul.f32 %v1942_v43, %v577_v3 }
 0x2f8   :  { %v1944_v59 = vpop.eup %1943 }
 0x2f9   :  { %v579_v58 = vadd.f32 %v1465_v60, %v578_v63  ;;  %v581_v56 = vsub.f32 1.0, %v1944_v59  ;;  %v583_v50 = vmul.f32 %v1944_v59, %v2547_v55 }
 0x2fb   :  { %1945 = vtanh.f32 %v579_v58 }
 0x308   :  { %v1946_v61 = vpop.eup %1945 }
 0x309   :  { %v582_v49 = vmul.f32 %v1946_v61, %v581_v56 }
 0x30b   :  { %v2633_v51 = vadd.f32 %v583_v50, %v582_v49  ;;  %v2730_v49 = vld [vmem:[%s3232_s1 + $0x168] sm:$0xff]  ;;  %v2737_v50 = vld [vmem:[%s3232_s1 + $0x158] sm:$0xff] }
 0x30d   :  { %1468 = vst [vmem:[%s3235_s3 + $0x10] sm:$0xff] %v2633_v51  ;;  %658 = vmatmul.mubr.f32.vlgmr.msra.gmra.mxu0 %v2633_v51  ;;  %1773 = vmatmul.mubr.f32.vlgmr.msra.gmra.mxu1 %v2633_v51 }
 0x30e   :  { %765 = vmatpush1.msra.mxu0 %v2076_v1  ;;  %1776 = vmatpush3.msra.mxu1 %v2150_v14  ;;  %v3252_v1 = vld [vmem:[#allocation4_spill] sm:$0xff] }
 0x30f   :  { %766 = vmatprep.subr.mxu0 %v2081_v2  ;;  %1777 = vmatprep.subr.mxu1 %v3249_v0  ;;  %v3253_v2 = vld [vmem:[#allocation5_spill] sm:$0xff] }
 0x310   :  { %767 = vmatpush1.msra.mxu0 %v2089_v4  ;;  %1778 = vmatpush3.msra.mxu1 %v2162_v16  ;;  %v3254_v4 = vld [vmem:[#allocation3_spill] sm:$0xff] }
 0x311   :  { %768 = vmatprep.subr.mxu0 %v2097_v5  ;;  %1779 = vmatprep.subr.mxu1 %v3249_v0  ;;  %v1469_v5 = vld [vmem:[%s3233_s0 + $0x48] sm:$0xff] }
 0x312   :  { %769 = vmatpush1.msra.mxu0 %v2103_v6  ;;  %1780 = vmatpush3.msra.mxu1 %v2174_v18 }
 0x313   :  { %770 = vmatprep.subr.mxu0 %v2109_v7  ;;  %1781 = vmatprep.subr.mxu1 %v3249_v0 }
 0x314   :  { %771 = vmatpush1.msra.mxu0 %v2115_v8  ;;  %1782 = vmatpush3.msra.mxu1 %v2193_v21 }
 0x315   :  { %772 = vmatprep.subr.mxu0 %v2121_v9  ;;  %1783 = vmatprep.subr.mxu1 %v3249_v0 }
 0x316   :  { %773 = vmatpush1.msra.mxu0 %v2127_v10  ;;  %1784 = vmatpush3.msra.mxu1 %v2212_v24 }
 0x317   :  { %774 = vmatprep.subr.mxu0 %v2133_v11  ;;  %1785 = vmatprep.subr.mxu1 %v3249_v0  ;;  %v1470_v11 = vld [vmem:[%s3233_s0 + $0x50] sm:$0xff] }
 0x318   :  { %775 = vmatpush1.msra.mxu0 %v2139_v12  ;;  %1786 = vmatpush3.msra.mxu1 %v2231_v27 }
 0x319   :  { %776 = vmatprep.subr.mxu0 %v2145_v13  ;;  %1787 = vmatprep.subr.mxu1 %v3249_v0 }
 0x31a   :  { %777 = vmatpush1.msra.mxu0 %v2156_v15  ;;  %1788 = vmatpush3.msra.mxu1 %v2250_v30 }
 0x31b   :  { %778 = vmatprep.subr.mxu0 %v2168_v17  ;;  %1789 = vmatprep.subr.mxu1 %v3249_v0 }
 0x31c   :  { %779 = vmatpush1.msra.mxu0 %v2180_v19  ;;  %1790 = vmatpush3.msra.mxu1 %v2269_v33 }
 0x31d   :  { %780 = vmatprep.subr.mxu0 %v2187_v20  ;;  %1791 = vmatprep.subr.mxu1 %v3249_v0 }
 0x31e   :  { %781 = vmatpush1.msra.mxu0 %v2199_v22  ;;  %1792 = vmatpush3.msra.mxu1 %v2288_v36 }
 0x31f   :  { %782 = vmatprep.subr.mxu0 %v2206_v23  ;;  %1793 = vmatprep.subr.mxu1 %v3249_v0 }
 0x320   :  { %783 = vmatpush1.msra.mxu0 %v2218_v25  ;;  %1794 = vmatpush3.msra.mxu1 %v2307_v39 }
 0x321   :  { %784 = vmatprep.subr.mxu0 %v2225_v26  ;;  %1795 = vmatprep.subr.mxu1 %v3249_v0 }
 0x322   :  { %785 = vmatpush1.msra.mxu0 %v2237_v28  ;;  %1796 = vmatpush3.msra.mxu1 %v2326_v42 }
 0x323   :  { %786 = vmatprep.subr.mxu0 %v2244_v29  ;;  %1797 = vmatprep.subr.mxu1 %v3249_v0 }
 0x324   :  { %787 = vmatpush1.msra.mxu0 %v2256_v31  ;;  %1798 = vmatpush3.msra.mxu1 %v2340_v44 }
 0x325   :  { %788 = vmatprep.subr.mxu0 %v2263_v32  ;;  %1799 = vmatprep.subr.mxu1 %v3249_v0 }
 0x326   :  { %789 = vmatpush1.msra.mxu0 %v2275_v34  ;;  %1800 = vmatpush3.msra.mxu1 %v2349_v45 }
 0x327   :  { %790 = vmatprep.subr.mxu0 %v2282_v35  ;;  %1801 = vmatprep.subr.mxu1 %v3249_v0 }
 0x328   :  { %791 = vmatpush1.msra.mxu0 %v2294_v37  ;;  %1802 = vmatpush3.msra.mxu1 %v2357_v46 }
 0x329   :  { %792 = vmatprep.subr.mxu0 %v2301_v38  ;;  %1803 = vmatprep.subr.mxu1 %v3249_v0 }
 0x32a   :  { %793 = vmatpush1.msra.mxu0 %v2313_v40  ;;  %1804 = vmatpush3.msra.mxu1 %v2366_v47 }
 0x32b   :  { %794 = vmatprep.subr.mxu0 %v2320_v41  ;;  %1805 = vmatprep.subr.mxu1 %v3249_v0 }
 0x32c   :  { %795 = vmatpush1.msra.mxu0 %v3252_v1  ;;  %828 = vmatprep.mubr.f32.mxu0 %v3249_v0 }
 0x32d   :  { %1806 = vmatpush3.msra.mxu1 %v3253_v2  ;;  %1807 = vmatprep.mubr.msk.f32.mxu1 %vm2047_vm0, %v3249_v0 }
 0x32e   :  { %935 = vmatprep.subr.mxu0 %v3254_v4  ;;  %1810 = vmatprep.subr.mxu1 %v3249_v0  ;;  %v2758_v4 = vld [vmem:[%s3232_s1 + $0x138] sm:$0xff] }
 0x3cd   :  { %v659_v6 = vpop.f32.mrf.mxu0  ;;  %v730_v7 = vpop.f32.mrf.mxu1 }
 0x3ce   :  { %v734_v8 = vadd.f32 %v1469_v5, %v659_v6  ;;  %v748_v48 = vadd.f32 %v2455_v62, %v730_v7  ;;  %v2772_v5 = vld [vmem:[%s3232_s1 + $0x120] sm:$0xff]  ;;  %v2786_v6 = vld [vmem:[%s3232_s1 + $0x108] sm:$0xff]  ;;  %v2800_v7 = vld [vmem:[%s3232_s1 + $0xf0] sm:$0xff] }
 0x3cf   :  { %v1774_v9 = vpop.f32.mrf.mxu1  ;;  %v661_v12 = vpop.f32.mrf.mxu0 }
 0x3d0   :  { %v1472_v10 = vmul.f32 -1.442695, %v734_v8  ;;  %v741_v13 = vadd.f32 %v1470_v11, %v661_v12  ;;  %v2814_v8 = vld [vmem:[%s3232_s1 + $0xd8] sm:$0xff]  ;;  %v2901_v9 = vld [vmem:[%s3232_s1 + $0x160] sm:$0xff]  ;;  %v2919_v11 = vld [vmem:[%s3232_s1 + $0x130] sm:$0xff] }
 0x3d1   :  { %v2928_v12 = vld [vmem:[%s3232_s1 + $0x118] sm:$0xff] }
 0x3d2   :  { %1947 = vpow2.f32 %v1472_v10  ;;  %v1473_v15 = vmul.f32 -1.442695, %v741_v13  ;;  %v2910_v10 = vld [vmem:[%s3232_s1 + $0x148] sm:$0xff]  ;;  %v2937_v13 = vld [vmem:[%s3232_s1 + $0x100] sm:$0xff] }
 0x3d4   :  { %1949 = vpow2.f32 %v1473_v15  ;;  %v2946_v15 = vld [vmem:[%s3232_s1 + $0xe8] sm:$0xff] }
 0x3df   :  { %v1948_v17 = vpop.eup %1947 }
 0x3e0   :  { %v738_v43 = vadd.f32 1.0, %v1948_v17  ;;  %v2954_v17 = vld [vmem:[%s3232_s1 + $0xc0] sm:$0xff] }
 0x3e1   :  { %v1950_v55 = vpop.eup %1949 }
 0x3e2   :  { %1951 = vrcp.f32 %v738_v43  ;;  %v745_v3 = vadd.f32 1.0, %v1950_v55  ;;  %v2960_v43 = vld [vmem:[%s3232_s1 + $0xd0] sm:$0xff] }
 0x3e3   :  { %v2966_v55 = vld [vmem:[%s3232_s1 + $0xb0] sm:$0xff] }
 0x3e4   :  { %1953 = vrcp.f32 %v745_v3  ;;  %v2973_v3 = vld [vmem:[%s3232_s1 + $0xa8] sm:$0xff] }
 0x3ef   :  { %v1952_v57 = vpop.eup %1951 }
 0x3f0   :  { %v749_v53 = vmul.f32 %v1952_v57, %v748_v48  ;;  %v2979_v48 = vld [vmem:[%s3232_s1 + $0xb8] sm:$0xff] }
 0x3f1   :  { %v1954_v60 = vpop.eup %1953  ;;  %v2985_v57 = vld [vmem:[%s3232_s1 + $0x98] sm:$0xff] }
 0x3f2   :  { %v750_v54 = vadd.f32 %v1471_v52, %v749_v53  ;;  %v752_v63 = vsub.f32 1.0, %v1954_v60  ;;  %v754_v56 = vmul.f32 %v1954_v60, %v2633_v51  ;;  %v2744_v51 = vld [vmem:[%s3232_s1 + $0x150] sm:$0xff]  ;;  %v2998_v53 = vld [vmem:[%s3232_s1 + $0xa0] sm:$0xff]  ;;  %v3011_v60 = vld [vmem:[%s3232_s1 + $0x78] sm:$0xff] }
 0x3f3   :  { %v2992_v52 = vld [vmem:[%s3232_s1 + $0x90] sm:$0xff] }
 0x3f4   :  { %1955 = vtanh.f32 %v750_v54  ;;  %v3004_v54 = vld [vmem:[%s3232_s1 + $0x80] sm:$0xff] }
 0x401   :  { %v1956_v58 = vpop.eup %1955 }
 0x402   :  { %v753_v59 = vmul.f32 %v1956_v58, %v752_v63  ;;  %v3017_v63 = vld [vmem:[%s3232_s1 + $0x88] sm:$0xff] }
 0x403   :  { %v3023_v58 = vld [vmem:[%s3232_s1 + $0x68] sm:$0xff] }
 0x404   :  { %v2719_v61 = vadd.f32 %v754_v56, %v753_v59  ;;  %v3030_v59 = vld [vmem:[%s3232_s1 + $0x60] sm:$0xff]  ;;  %v3036_v56 = vld [vmem:[%s3232_s1 + $0x70] sm:$0xff] }
 0x406   :  { %1474 = vst [vmem:[%s3235_s3 + $0x18] sm:$0xff] %v2719_v61  ;;  %829 = vmatmul.mubr.f32.vlgmr.msra.gmra.mxu0 %v2719_v61  ;;  %1808 = vmatmul.mubr.f32.vlgmr.msra.gmra.mxu1 %v2719_v61 }
 0x407   :  { %936 = vmatpush1.msra.mxu0 %v2730_v49  ;;  %1811 = vmatpush3.msra.mxu1 %v2150_v14  ;;  %v2751_v14 = vld [vmem:[%s3232_s1 + $0x140] sm:$0xff] }
 0x408   :  { %937 = vmatprep.subr.mxu0 %v2737_v50  ;;  %1812 = vmatprep.subr.mxu1 %v3249_v0 }
 0x409   :  { %938 = vmatpush1.msra.mxu0 %v2744_v51  ;;  %1813 = vmatpush3.msra.mxu1 %v2162_v16  ;;  %v2765_v16 = vld [vmem:[%s3232_s1 + $0x128] sm:$0xff] }
 0x40a   :  { %939 = vmatprep.subr.mxu0 %v2751_v14  ;;  %1814 = vmatprep.subr.mxu1 %v3249_v0 }
 0x40b   :  { %940 = vmatpush1.msra.mxu0 %v2758_v4  ;;  %1815 = vmatpush3.msra.mxu1 %v2174_v18  ;;  %v2779_v18 = vld [vmem:[%s3232_s1 + $0x110] sm:$0xff] }
 0x40c   :  { %941 = vmatprep.subr.mxu0 %v2765_v16  ;;  %1816 = vmatprep.subr.mxu1 %v3249_v0 }
 0x40d   :  { %942 = vmatpush1.msra.mxu0 %v2772_v5  ;;  %1817 = vmatpush3.msra.mxu1 %v2193_v21  ;;  %v2793_v21 = vld [vmem:[%s3232_s1 + $0xf8] sm:$0xff] }
 0x40e   :  { %943 = vmatprep.subr.mxu0 %v2779_v18  ;;  %1818 = vmatprep.subr.mxu1 %v3249_v0 }
 0x40f   :  { %944 = vmatpush1.msra.mxu0 %v2786_v6  ;;  %1819 = vmatpush3.msra.mxu1 %v2212_v24  ;;  %v2807_v24 = vld [vmem:[%s3232_s1 + $0xe0] sm:$0xff] }
 0x410   :  { %945 = vmatprep.subr.mxu0 %v2793_v21  ;;  %1820 = vmatprep.subr.mxu1 %v3249_v0 }
 0x411   :  { %946 = vmatpush1.msra.mxu0 %v2800_v7  ;;  %1821 = vmatpush3.msra.mxu1 %v2231_v27  ;;  %v2821_v27 = vld [vmem:[%s3232_s1 + $0xc8] sm:$0xff] }
 0x412   :  { %947 = vmatprep.subr.mxu0 %v2807_v24  ;;  %1822 = vmatprep.subr.mxu1 %v3249_v0 }
 0x413   :  { %948 = vmatpush1.msra.mxu0 %v2814_v8  ;;  %1823 = vmatpush3.msra.mxu1 %v2250_v30 }
 0x414   :  { %949 = vmatprep.subr.mxu0 %v2821_v27  ;;  %1824 = vmatprep.subr.mxu1 %v3249_v0 }
 0x415   :  { %950 = vmatpush1.msra.mxu0 %v2180_v19  ;;  %1825 = vmatpush3.msra.mxu1 %v2269_v33  ;;  %v2865_v19 = vld [vmem:[%s3232_s1 + $0x170] sm:$0xff] }
 0x416   :  { %951 = vmatprep.subr.mxu0 %v2187_v20  ;;  %1826 = vmatprep.subr.mxu1 %v3249_v0  ;;  %v1475_v20 = vld [vmem:[%s3233_s0 + $0x60] sm:$0xff] }
 0x417   :  { %952 = vmatpush1.msra.mxu0 %v2199_v22  ;;  %1827 = vmatpush3.msra.mxu1 %v2288_v36 }
 0x418   :  { %953 = vmatprep.subr.mxu0 %v2206_v23  ;;  %1828 = vmatprep.subr.mxu1 %v3249_v0 }
 0x419   :  { %954 = vmatpush1.msra.mxu0 %v2218_v25  ;;  %1829 = vmatpush3.msra.mxu1 %v2307_v39  ;;  %v1477_v39 = vld [vmem:[%s3233_s0 + $0x70] sm:$0xff] }
 0x41a   :  { %955 = vmatprep.subr.mxu0 %v2225_v26  ;;  %1830 = vmatprep.subr.mxu1 %v3249_v0 }
 0x41b   :  { %956 = vmatpush1.msra.mxu0 %v2237_v28  ;;  %1831 = vmatpush3.msra.mxu1 %v2326_v42 }
 0x41c   :  { %957 = vmatprep.subr.mxu0 %v2244_v29  ;;  %1832 = vmatprep.subr.mxu1 %v3249_v0  ;;  %v1476_v29 = vld [vmem:[%s3233_s0 + $0x68] sm:$0xff] }
 0x41d   :  { %958 = vmatpush1.msra.mxu0 %v2256_v31  ;;  %1833 = vmatpush3.msra.mxu1 %v2340_v44 }
 0x41e   :  { %959 = vmatprep.subr.mxu0 %v2263_v32  ;;  %1834 = vmatprep.subr.mxu1 %v3249_v0 }
 0x41f   :  { %960 = vmatpush1.msra.mxu0 %v2275_v34  ;;  %1835 = vmatpush3.msra.mxu1 %v2349_v45 }
 0x420   :  { %961 = vmatprep.subr.mxu0 %v2282_v35  ;;  %1836 = vmatprep.subr.mxu1 %v3249_v0 }
 0x421   :  { %962 = vmatpush1.msra.mxu0 %v2294_v37  ;;  %1837 = vmatpush3.msra.mxu1 %v2357_v46 }
 0x422   :  { %963 = vmatprep.subr.mxu0 %v2301_v38  ;;  %1838 = vmatprep.subr.mxu1 %v3249_v0 }
 0x423   :  { %964 = vmatpush1.msra.mxu0 %v2313_v40  ;;  %1839 = vmatpush3.msra.mxu1 %v2366_v47 }
 0x424   :  { %965 = vmatprep.subr.mxu0 %v2320_v41  ;;  %1840 = vmatprep.subr.mxu1 %v3249_v0 }
 0x425   :  { %966 = vmatpush1.msra.mxu0 %v3252_v1  ;;  %999 = vmatprep.mubr.f32.mxu0 %v3249_v0 }
 0x426   :  { %1841 = vmatpush3.msra.mxu1 %v3253_v2  ;;  %1842 = vmatprep.mubr.msk.f32.mxu1 %vm2047_vm0, %v3249_v0  ;;  %v2892_v2 = vld [vmem:[%s3232_s1 + $0x178] sm:$0xff] }
 0x427   :  { %1106 = vmatprep.subr.mxu0 %v2865_v19  ;;  %1845 = vmatprep.subr.mxu1 %v3249_v0 }
 0x4c6   :  { %v830_v22 = vpop.f32.mrf.mxu0  ;;  %v901_v23 = vpop.f32.mrf.mxu1 }
 0x4c7   :  { %v905_v25 = vadd.f32 %v1475_v20, %v830_v22  ;;  %v919_v37 = vadd.f32 %v2455_v62, %v901_v23  ;;  %v3049_v20 = vld [vmem:[%s3232_s1 + $0x48] sm:$0xff]  ;;  %v3055_v22 = vld [vmem:[%s3232_s1 + $0x58] sm:$0xff] }
 0x4c8   :  { %v1809_v26 = vpop.f32.mrf.mxu1  ;;  %v832_v30 = vpop.f32.mrf.mxu0  ;;  %v3061_v23 = vld [vmem:[%s3232_s1 + $0x38] sm:$0xff] }
 0x4c9   :  { %v1478_v28 = vmul.f32 -1.442695, %v905_v25  ;;  %v912_v31 = vadd.f32 %v1476_v29, %v832_v30  ;;  %v3068_v25 = vld [vmem:[%s3232_s1 + $0x30] sm:$0xff]  ;;  %v3074_v26 = vld [vmem:[%s3232_s1 + $0x40] sm:$0xff]  ;;  %v3087_v29 = vld [vmem:[%s3232_s1 + $0x18] sm:$0xff] }
 0x4ca   :  { %v3093_v30 = vld [vmem:[%s3232_s1 + $0x28] sm:$0xff] }
 0x4cb   :  { %1957 = vpow2.f32 %v1478_v28  ;;  %v1479_v32 = vmul.f32 -1.442695, %v912_v31  ;;  %v3080_v28 = vld [vmem:[%s3232_s1 + $0x20] sm:$0xff]  ;;  %v3099_v31 = vld [vmem:[%s3232_s1 + $0x8] sm:$0xff] }
 0x4cd   :  { %1959 = vpow2.f32 %v1479_v32  ;;  %v3106_v32 = vld [vmem:[%s3232_s1] sm:$0xff] }
 0x4ce   :  { %3255 = vst [vmem:[#allocation4_spill] sm:$0xff] %v3106_v32 }
 0x4d8   :  { %v1958_v33 = vpop.eup %1957 }
 0x4d9   :  { %v909_v34 = vadd.f32 1.0, %v1958_v33  ;;  %v3113_v33 = vld [vmem:[%s3232_s1 + $0x10] sm:$0xff] }
 0x4da   :  { %v1960_v35 = vpop.eup %1959  ;;  %3256 = vst [vmem:[#allocation5_spill] sm:$0xff] %v3113_v33 }
 0x4db   :  { %1961 = vrcp.f32 %v909_v34  ;;  %v916_v36 = vadd.f32 1.0, %v1960_v35  ;;  %v1481_v34 = vld [vmem:[%s3233_s0 + $0x78] sm:$0xff] }
 0x4dd   :  { %1963 = vrcp.f32 %v916_v36 }
 0x4e8   :  { %v1962_v38 = vpop.eup %1961 }
 0x4e9   :  { %v920_v40 = vmul.f32 %v1962_v38, %v919_v37 }
 0x4ea   :  { %v1964_v42 = vpop.eup %1963 }
 0x4eb   :  { %v921_v41 = vadd.f32 %v1477_v39, %v920_v40  ;;  %v923_v44 = vsub.f32 1.0, %v1964_v42  ;;  %v925_v47 = vmul.f32 %v1964_v42, %v2719_v61  ;;  %v3042_v61 = vld [vmem:[%s3232_s1 + $0x50] sm:$0xff]  ;;  %v1482_v40 = vld [vmem:[%s3233_s0 + $0x80] sm:$0xff] }
 0x4ed   :  { %1965 = vtanh.f32 %v921_v41 }
 0x4fa   :  { %v1966_v45 = vpop.eup %1965 }
 0x4fb   :  { %v924_v46 = vmul.f32 %v1966_v45, %v923_v44 }
 0x4fd   :  { %v2880_v1 = vadd.f32 %v925_v47, %v924_v46 }
 0x4ff   :  { %1480 = vst [vmem:[%s3235_s3 + $0x20] sm:$0xff] %v2880_v1  ;;  %1000 = vmatmul.mubr.f32.vlgmr.msra.gmra.mxu0 %v2880_v1  ;;  %1843 = vmatmul.mubr.f32.vlgmr.msra.gmra.mxu1 %v2880_v1 }
 0x500   :  { %1107 = vmatpush1.msra.mxu0 %v2730_v49  ;;  %1846 = vmatpush3.msra.mxu1 %v2892_v2 }
 0x501   :  { %1108 = vmatprep.subr.mxu0 %v2737_v50  ;;  %1847 = vmatprep.subr.mxu1 %v3249_v0 }
 0x502   :  { %1109 = vmatpush1.msra.mxu0 %v2744_v51  ;;  %1848 = vmatpush3.msra.mxu1 %v2901_v9 }
 0x503   :  { %1110 = vmatprep.subr.mxu0 %v2751_v14  ;;  %1849 = vmatprep.subr.mxu1 %v3249_v0 }
 0x504   :  { %1111 = vmatpush1.msra.mxu0 %v2758_v4  ;;  %1850 = vmatpush3.msra.mxu1 %v2910_v10 }
 0x505   :  { %1112 = vmatprep.subr.mxu0 %v2765_v16  ;;  %1851 = vmatprep.subr.mxu1 %v3249_v0 }
 0x506   :  { %1113 = vmatpush1.msra.mxu0 %v2772_v5  ;;  %1852 = vmatpush3.msra.mxu1 %v2919_v11 }
 0x507   :  { %1114 = vmatprep.subr.mxu0 %v2779_v18  ;;  %1853 = vmatprep.subr.mxu1 %v3249_v0 }
 0x508   :  { %1115 = vmatpush1.msra.mxu0 %v2786_v6  ;;  %1854 = vmatpush3.msra.mxu1 %v2928_v12 }
 0x509   :  { %1116 = vmatprep.subr.mxu0 %v2793_v21  ;;  %1855 = vmatprep.subr.mxu1 %v3249_v0 }
 0x50a   :  { %1117 = vmatpush1.msra.mxu0 %v2800_v7  ;;  %1856 = vmatpush3.msra.mxu1 %v2937_v13 }
 0x50b   :  { %1118 = vmatprep.subr.mxu0 %v2807_v24  ;;  %1857 = vmatprep.subr.mxu1 %v3249_v0 }
 0x50c   :  { %1119 = vmatpush1.msra.mxu0 %v2814_v8  ;;  %1858 = vmatpush3.msra.mxu1 %v2946_v15 }
 0x50d   :  { %1120 = vmatprep.subr.mxu0 %v2821_v27  ;;  %1859 = vmatprep.subr.mxu1 %v3249_v0 }
 0x50e   :  { %1121 = vmatpush1.msra.mxu0 %v2954_v17  ;;  %1860 = vmatpush3.msra.mxu1 %v2960_v43 }
 0x50f   :  { %1122 = vmatprep.subr.mxu0 %v2966_v55  ;;  %1861 = vmatprep.subr.mxu1 %v3249_v0 }
 0x510   :  { %1123 = vmatpush1.msra.mxu0 %v2973_v3  ;;  %1862 = vmatpush3.msra.mxu1 %v2979_v48 }
 0x511   :  { %1124 = vmatprep.subr.mxu0 %v2985_v57  ;;  %1863 = vmatprep.subr.mxu1 %v3249_v0 }
 0x512   :  { %1125 = vmatpush1.msra.mxu0 %v2992_v52  ;;  %1864 = vmatpush3.msra.mxu1 %v2998_v53 }
 0x513   :  { %1126 = vmatprep.subr.mxu0 %v3004_v54  ;;  %1865 = vmatprep.subr.mxu1 %v3249_v0 }
 0x514   :  { %1127 = vmatpush1.msra.mxu0 %v3011_v60  ;;  %1866 = vmatpush3.msra.mxu1 %v3017_v63 }
 0x515   :  { %1128 = vmatprep.subr.mxu0 %v3023_v58  ;;  %1867 = vmatprep.subr.mxu1 %v3249_v0 }
 0x516   :  { %1129 = vmatpush1.msra.mxu0 %v3030_v59  ;;  %1868 = vmatpush3.msra.mxu1 %v3036_v56 }
 0x517   :  { %1130 = vmatprep.subr.mxu0 %v3042_v61  ;;  %1869 = vmatprep.subr.mxu1 %v3249_v0 }
 0x518   :  { %1131 = vmatpush1.msra.mxu0 %v3049_v20  ;;  %1870 = vmatpush3.msra.mxu1 %v3055_v22 }
 0x519   :  { %1132 = vmatprep.subr.mxu0 %v3061_v23  ;;  %1871 = vmatprep.subr.mxu1 %v3249_v0 }
 0x51a   :  { %1133 = vmatpush1.msra.mxu0 %v3068_v25  ;;  %1872 = vmatpush3.msra.mxu1 %v3074_v26 }
 0x51b   :  { %1134 = vmatprep.subr.mxu0 %v3080_v28  ;;  %1873 = vmatprep.subr.mxu1 %v3249_v0 }
 0x51c   :  { %1135 = vmatpush1.msra.mxu0 %v3087_v29  ;;  %1874 = vmatpush3.msra.mxu1 %v3093_v30 }
 0x51d   :  { %1136 = vmatprep.subr.mxu0 %v3099_v31  ;;  %1875 = vmatprep.subr.mxu1 %v3249_v0 }
 0x51e   :  { %1137 = vmatpush1.msra.mxu0 %v3106_v32  ;;  %1170 = vmatprep.mubr.f32.mxu0 %v3249_v0 }
 0x51f   :  { %1876 = vmatpush3.msra.mxu1 %v3113_v33  ;;  %1877 = vmatprep.mubr.msk.f32.mxu1 %vm2047_vm0, %v3249_v0 }
 0x520   :  { %1277 = vmatprep.subr.mxu0 %v2865_v19  ;;  %1880 = vmatprep.subr.mxu1 %v3249_v0 }
 0x5bf   :  { %v1001_v35 = vpop.f32.mrf.mxu0  ;;  %v1072_v36 = vpop.f32.mrf.mxu1 }
 0x5c0   :  { %v1076_v37 = vadd.f32 %v1481_v34, %v1001_v35  ;;  %v1090_v33 = vadd.f32 %v2455_v62, %v1072_v36  ;;  %v1483_v34 = vld [vmem:[%s3233_s0 + $0x88] sm:$0xff] }
 0x5c1   :  { %v1844_v38 = vpop.f32.mrf.mxu1  ;;  %v1003_v41 = vpop.f32.mrf.mxu0  ;;  %v3257_v62 = vld [vmem:[#allocation4_spill] sm:$0xff] }
 0x5c2   :  { %v1484_v39 = vmul.f32 -1.442695, %v1076_v37  ;;  %v1083_v42 = vadd.f32 %v1482_v40, %v1003_v41 }
 0x5c4   :  { %1967 = vpow2.f32 %v1484_v39  ;;  %v1485_v44 = vmul.f32 -1.442695, %v1083_v42 }
 0x5c6   :  { %1969 = vpow2.f32 %v1485_v44 }
 0x5d1   :  { %v1968_v19 = vpop.eup %1967 }
 0x5d2   :  { %v1080_v45 = vadd.f32 1.0, %v1968_v19 }
 0x5d3   :  { %v1970_v46 = vpop.eup %1969 }
 0x5d4   :  { %1971 = vrcp.f32 %v1080_v45  ;;  %v1087_v47 = vadd.f32 1.0, %v1970_v46 }
 0x5d6   :  { %1973 = vrcp.f32 %v1087_v47 }
 0x5e1   :  { %v1972_v32 = vpop.eup %1971 }
 0x5e2   :  { %v1091_v35 = vmul.f32 %v1972_v32, %v1090_v33 }
 0x5e3   :  { %v1974_v38 = vpop.eup %1973 }
 0x5e4   :  { %v1092_v37 = vadd.f32 %v1483_v34, %v1091_v35  ;;  %v1094_v39 = vsub.f32 1.0, %v1974_v38  ;;  %v1096_v42 = vmul.f32 %v1974_v38, %v2880_v1  ;;  %v2045_v1 = vld [vmem:[%s3234_s2] ss:$0 sm:$0xff] }
 0x5e6   :  { %1975 = vtanh.f32 %v1092_v37 }
 0x5f3   :  { %v1976_v40 = vpop.eup %1975 }
 0x5f4   :  { %v1095_v41 = vmul.f32 %v1976_v40, %v1094_v39 }
 0x5f6   :  { %v3131_v44 = vadd.f32 %v1096_v42, %v1095_v41 }
 0x5f8   :  { %1486 = vst [vmem:[%s3235_s3 + $0x28] sm:$0xff] %v3131_v44  ;;  %1171 = vmatmul.mubr.f32.vlgmr.msra.gmra.mxu0 %v3131_v44  ;;  %1878 = vmatmul.mubr.f32.vlgmr.msra.gmra.mxu1 %v3131_v44 }
 0x5f9   :  { %1278 = vmatpush1.msra.mxu0 %v2730_v49  ;;  %1881 = vmatpush3.msra.mxu1 %v2892_v2  ;;  %v3258_v49 = vld [vmem:[#allocation5_spill] sm:$0xff] }
 0x5fa   :  { %1279 = vmatprep.subr.mxu0 %v2737_v50  ;;  %1882 = vmatprep.subr.mxu1 %v3249_v0  ;;  %v1487_v50 = vld [vmem:[%s3233_s0 + $0x90] sm:$0xff] }
 0x5fb   :  { %1280 = vmatpush1.msra.mxu0 %v2744_v51  ;;  %1883 = vmatpush3.msra.mxu1 %v2901_v9 }
 0x5fc   :  { %1281 = vmatprep.subr.mxu0 %v2751_v14  ;;  %1884 = vmatprep.subr.mxu1 %v3249_v0 }
 0x5fd   :  { %1282 = vmatpush1.msra.mxu0 %v2758_v4  ;;  %1885 = vmatpush3.msra.mxu1 %v2910_v10  ;;  %v1489_v10 = vld [vmem:[%s3233_s0 + $0xa0] sm:$0xff] }
 0x5fe   :  { %1283 = vmatprep.subr.mxu0 %v2765_v16  ;;  %1886 = vmatprep.subr.mxu1 %v3249_v0 }
 0x5ff   :  { %1284 = vmatpush1.msra.mxu0 %v2772_v5  ;;  %1887 = vmatpush3.msra.mxu1 %v2919_v11 }
 0x600   :  { %1285 = vmatprep.subr.mxu0 %v2779_v18  ;;  %1888 = vmatprep.subr.mxu1 %v3249_v0  ;;  %v1488_v18 = vld [vmem:[%s3233_s0 + $0x98] sm:$0xff] }
 0x601   :  { %1286 = vmatpush1.msra.mxu0 %v2786_v6  ;;  %1889 = vmatpush3.msra.mxu1 %v2928_v12 }
 0x602   :  { %1287 = vmatprep.subr.mxu0 %v2793_v21  ;;  %1890 = vmatprep.subr.mxu1 %v3249_v0 }
 0x603   :  { %1288 = vmatpush1.msra.mxu0 %v2800_v7  ;;  %1891 = vmatpush3.msra.mxu1 %v2937_v13 }
 0x604   :  { %1289 = vmatprep.subr.mxu0 %v2807_v24  ;;  %1892 = vmatprep.subr.mxu1 %v3249_v0 }
 0x605   :  { %1290 = vmatpush1.msra.mxu0 %v2814_v8  ;;  %1893 = vmatpush3.msra.mxu1 %v2946_v15 }
 0x606   :  { %1291 = vmatprep.subr.mxu0 %v2821_v27  ;;  %1894 = vmatprep.subr.mxu1 %v3249_v0 }
 0x607   :  { %1292 = vmatpush1.msra.mxu0 %v2954_v17  ;;  %1895 = vmatpush3.msra.mxu1 %v2960_v43 }
 0x608   :  { %1293 = vmatprep.subr.mxu0 %v2966_v55  ;;  %1896 = vmatprep.subr.mxu1 %v3249_v0 }
 0x609   :  { %1294 = vmatpush1.msra.mxu0 %v2973_v3  ;;  %1897 = vmatpush3.msra.mxu1 %v2979_v48  ;;  %v1493_v48 = vld [vmem:[%s3233_s0 + $0xa8] sm:$0xff] }
 0x60a   :  { %1295 = vmatprep.subr.mxu0 %v2985_v57  ;;  %1898 = vmatprep.subr.mxu1 %v3249_v0 }
 0x60b   :  { %1296 = vmatpush1.msra.mxu0 %v2992_v52  ;;  %1899 = vmatpush3.msra.mxu1 %v2998_v53 }
 0x60c   :  { %1297 = vmatprep.subr.mxu0 %v3004_v54  ;;  %1900 = vmatprep.subr.mxu1 %v3249_v0 }
 0x60d   :  { %1298 = vmatpush1.msra.mxu0 %v3011_v60  ;;  %1901 = vmatpush3.msra.mxu1 %v3017_v63  ;;  %v1494_v63 = vld [vmem:[%s3233_s0 + $0xb0] sm:$0xff] }
 0x60e   :  { %1299 = vmatprep.subr.mxu0 %v3023_v58  ;;  %1902 = vmatprep.subr.mxu1 %v3249_v0 }
 0x60f   :  { %1300 = vmatpush1.msra.mxu0 %v3030_v59  ;;  %1903 = vmatpush3.msra.mxu1 %v3036_v56 }
 0x610   :  { %1301 = vmatprep.subr.mxu0 %v3042_v61  ;;  %1904 = vmatprep.subr.mxu1 %v3249_v0 }
 0x611   :  { %1302 = vmatpush1.msra.mxu0 %v3049_v20  ;;  %1905 = vmatpush3.msra.mxu1 %v3055_v22 }
 0x612   :  { %1303 = vmatprep.subr.mxu0 %v3061_v23  ;;  %1906 = vmatprep.subr.mxu1 %v3249_v0 }
 0x613   :  { %1304 = vmatpush1.msra.mxu0 %v3068_v25  ;;  %1907 = vmatpush3.msra.mxu1 %v3074_v26 }
 0x614   :  { %1305 = vmatprep.subr.mxu0 %v3080_v28  ;;  %1908 = vmatprep.subr.mxu1 %v3249_v0  ;;  %v1495_v28 = vld [vmem:[%s3233_s0 + $0xb8] sm:$0xff] }
 0x615   :  { %1306 = vmatpush1.msra.mxu0 %v3087_v29  ;;  %1909 = vmatpush3.msra.mxu1 %v3093_v30 }
 0x616   :  { %1307 = vmatprep.subr.mxu0 %v3099_v31  ;;  %1910 = vmatprep.subr.mxu1 %v3249_v0 }
 0x617   :  { %1308 = vmatpush1.msra.mxu0 %v3257_v62  ;;  %1341 = vmatprep.mubr.f32.mxu0 %v3249_v0 }
 0x618   :  { %1911 = vmatpush3.msra.mxu1 %v3258_v49  ;;  %1912 = vmatprep.mubr.msk.f32.mxu1 %vm2047_vm0, %v3249_v0 }
 0x6b8   :  { %v1172_v51 = vpop.f32.mrf.mxu0  ;;  %v1243_v14 = vpop.f32.mrf.mxu1 }
 0x6b9   :  { %v1247_v4 = vadd.f32 %v1487_v50, %v1172_v51  ;;  %v1261_v2 = vadd.f32 %v2045_v1, %v1243_v14 }
 0x6ba   :  { %v1879_v16 = vpop.f32.mrf.mxu1  ;;  %v1174_v6 = vpop.f32.mrf.mxu0 }
 0x6bb   :  { %v1490_v5 = vmul.f32 -1.442695, %v1247_v4  ;;  %v1254_v21 = vadd.f32 %v1488_v18, %v1174_v6 }
 0x6bd   :  { %1977 = vpow2.f32 %v1490_v5  ;;  %v1491_v7 = vmul.f32 -1.442695, %v1254_v21 }
 0x6bf   :  { %1979 = vpow2.f32 %v1491_v7 }
 0x6ca   :  { %v1978_v24 = vpop.eup %1977 }
 0x6cb   :  { %v1251_v0 = vadd.f32 1.0, %v1978_v24 }
 0x6cc   :  { %v1980_v8 = vpop.eup %1979 }
 0x6cd   :  { %1981 = vrcp.f32 %v1251_v0  ;;  %v1258_v27 = vadd.f32 1.0, %v1980_v8 }
 0x6cf   :  { %1983 = vrcp.f32 %v1258_v27 }
 0x6da   :  { %v1982_v9 = vpop.eup %1981 }
 0x6db   :  { %v1262_v11 = vmul.f32 %v1982_v9, %v1261_v2 }
 0x6dc   :  { %v1984_v13 = vpop.eup %1983 }
 0x6dd   :  { %v1263_v12 = vadd.f32 %v1489_v10, %v1262_v11  ;;  %v1265_v15 = vsub.f32 1.0, %v1984_v13  ;;  %v1267_v55 = vmul.f32 %v1984_v13, %v3131_v44 }
 0x6df   :  { %1985 = vtanh.f32 %v1263_v12 }
 0x6ec   :  { %v1986_v17 = vpop.eup %1985 }
 0x6ed   :  { %v1266_v43 = vmul.f32 %v1986_v17, %v1265_v15 }
 0x6ef   :  { %v1268_v3 = vadd.f32 %v1267_v55, %v1266_v43 }
 0x6f1   :  { %1492 = vst [vmem:[%s3235_s3 + $0x30] sm:$0xff] %v1268_v3  ;;  %1342 = vmatmul.mubr.f32.vlgmr.msra.gmra.mxu0 %v1268_v3  ;;  %1913 = vmatmul.mubr.f32.vlgmr.msra.gmra.mxu1 %v1268_v3 }
 0x7b1   :  { %v1343_v57 = vpop.f32.mrf.mxu0  ;;  %v1414_v52 = vpop.f32.mrf.mxu1 }
 0x7b2   :  { %v1418_v53 = vadd.f32 %v1493_v48, %v1343_v57  ;;  %v1432_v25 = vadd.f32 %v2045_v1, %v1414_v52 }
 0x7b3   :  { %v1914_v54 = vpop.f32.mrf.mxu1  ;;  %v1345_v58 = vpop.f32.mrf.mxu0 }
 0x7b4   :  { %v1496_v60 = vmul.f32 -1.442695, %v1418_v53  ;;  %v1425_v59 = vadd.f32 %v1494_v63, %v1345_v58 }
 0x7b6   :  { %1987 = vpow2.f32 %v1496_v60  ;;  %v1497_v56 = vmul.f32 -1.442695, %v1425_v59 }
 0x7b8   :  { %1989 = vpow2.f32 %v1497_v56 }
 0x7c3   :  { %v1988_v61 = vpop.eup %1987 }
 0x7c4   :  { %v1422_v20 = vadd.f32 1.0, %v1988_v61 }
 0x7c5   :  { %v1990_v22 = vpop.eup %1989 }
 0x7c6   :  { %1991 = vrcp.f32 %v1422_v20  ;;  %v1429_v23 = vadd.f32 1.0, %v1990_v22 }
 0x7c8   :  { %1993 = vrcp.f32 %v1429_v23 }
 0x7d3   :  { %v1992_v26 = vpop.eup %1991 }
 0x7d4   :  { %v1433_v29 = vmul.f32 %v1992_v26, %v1432_v25 }
 0x7d5   :  { %v1994_v31 = vpop.eup %1993 }
 0x7d6   :  { %v1434_v30 = vadd.f32 %v1495_v28, %v1433_v29  ;;  %v1436_v32 = vsub.f32 1.0, %v1994_v31  ;;  %v1438_v19 = vmul.f32 %v1994_v31, %v1268_v3 }
 0x7d8   :  { %1995 = vtanh.f32 %v1434_v30 }
 0x7e5   :  { %v1996_v33 = vpop.eup %1995 }
 0x7e6   :  { %v1437_v36 = vmul.f32 %v1996_v33, %v1436_v32 }
 0x7e8   :  { %v1439_v45 = vadd.f32 %v1438_v19, %v1437_v36 }
 0x7ea   :  { %1498 = vst [vmem:[%s3235_s3 + $0x38] sm:$0xff] %v1439_v45 }

</bundles_post_ra>
